<compile_context>
chip_gen: v7x
topology: tpu7x:2x2x1
jax: 0.10.0
libtpu: 0.0.40
codegen_flags: <defaults>
</compile_context>

<pallas_src>
import math
import functools

import jax
import jax.numpy as jnp
from jax.experimental import pallas as pl
from jax.experimental.pallas import tpu as pltpu


# ----------------------------------------------------------------------------
# Fused Pallas kernel: embed+gate (l=0) followed by L RelationTrans layers,
# row-tiled over query rows (second grid axis).
# ----------------------------------------------------------------------------

def _salt_fused_kernel(feat_ref, prev_ref, win_ref, wg_ref, bg_ref, mask_ref,
                       wqkv_ref, wo_ref, w1_ref, b1_ref, w2_ref, b2_ref,
                       ent_ref, mem_ref, e_sc, qkv_sc,
                       *, att_dim, tile_n, num_layers, scale):
    """One grid step.

    feat : [TN, F]     entity relational features (row tile, l=0 only)
    prev : [TN, D]     previous (masked) memory-cell embeddings (l=0 only)
    win  : [F, D]      Win weight (bf16)
    wg   : [2, D, D]   stacked gate weights Wgx / Wgh (bf16)
    bg   : [1, D]      gate bias (f32)
    mask : [TN, N]     additive attention mask rows (bf16: 0 / -1e9)
    wqkv : [1, D, 3A]  per-layer fused Q|K|V weight (bf16)
    wo   : [1, A, D]  w1: [1, D, H]  b1: [1, 1, H]  w2: [1, H, D]  b2: [1, 1, D]
    ent  : [TN, D]     final entity embeddings (written at l == num_layers)
    mem  : [TN, D]     new memory cells (written at l == 0)
    e_sc : [N, D] f32  VMEM-resident activation carry (all rows)
    qkv_sc: [N, 3A] bf16  per-layer Q|K|V cache (all rows)
    """
    l = pl.program_id(0)                       # 0 = embed/gate, 1..L = layers
    r = pl.program_id(1)                       # query-row tile index
    row0 = pl.multiple_of(r * tile_n, tile_n)

    # ---- l == 0: L1-normalize -> Win -> AdaptiveGate for row tile r ---------
    @pl.when(l == 0)
    def _embed_gate():
        feat = feat_ref[...].astype(jnp.float32)
        # F.normalize(p=1, dim=-1): x / max(sum(|x|), eps)   (exact divide)
        denom = jnp.maximum(jnp.sum(jnp.abs(feat), axis=-1, keepdims=True),
                            1e-12)
        normed = feat / denom

        ent = jnp.dot(normed.astype(jnp.bfloat16), win_ref[...],
                      preferred_element_type=jnp.float32)          # [TN, D]
        prev = prev_ref[...]                                        # [TN, D]

        # gate: sigmoid(ent @ Wgx + prev @ Wgh + bg)  — no [N,2D] concat copy
        z = jax.nn.sigmoid(
            jnp.dot(ent.astype(jnp.bfloat16), wg_ref[0],
                    preferred_element_type=jnp.float32)
            + jnp.dot(prev.astype(jnp.bfloat16), wg_ref[1],
                      preferred_element_type=jnp.float32)
            + bg_ref[...])
        gated = z * ent + (1.0 - z) * prev

        e_sc[pl.ds(row0, tile_n), :] = gated
        mem_ref[...] = gated            # memory cells = gated (pre-layers)

    # ---- l >= 1: RelationTrans layer l for query rows r ---------------------
    @pl.when(l > 0)
    def _relation_trans():
        # Refresh the bf16 Q|K|V cache once per layer from the full carry.
        @pl.when(r == 0)
        def _project_qkv():
            e_all = e_sc[...].astype(jnp.bfloat16)                  # [N, D]
            qkv_sc[...] = jnp.dot(
                e_all, wqkv_ref[0],
                preferred_element_type=jnp.float32).astype(jnp.bfloat16)

        e_rows = e_sc[pl.ds(row0, tile_n), :]                       # f32 [TN,D]
        qkv_rows = qkv_sc[pl.ds(row0, tile_n), :]                   # bf16
        q = qkv_rows[:, :att_dim]                                   # [TN, A]
        k = qkv_sc[:, att_dim:2 * att_dim]                          # [N, A]
        v = qkv_sc[:, 2 * att_dim:]                                 # [N, A]

        # q @ k^T without materializing a transpose
        scores = jax.lax.dot_general(
            q, k, (((1,), (1,)), ((), ())),
            preferred_element_type=jnp.float32) * scale             # [TN, N]
        scores = scores + mask_ref[...].astype(jnp.float32)         # additive

        # numerically-stable softmax over neighbors (f32)
        scores = scores - jnp.max(scores, axis=-1, keepdims=True)
        p = jnp.exp(scores)
        p = p * pl.reciprocal(jnp.sum(p, axis=-1, keepdims=True), approx=True)

        msg = jnp.dot(p.astype(jnp.bfloat16), v,
                      preferred_element_type=jnp.float32)           # [TN, A]
        h = e_rows + jnp.dot(msg.astype(jnp.bfloat16), wo_ref[0],
                             preferred_element_type=jnp.float32)

        ff = jnp.maximum(
            jnp.dot(h.astype(jnp.bfloat16), w1_ref[0],
                    preferred_element_type=jnp.float32) + b1_ref[0],
            0.0)
        out = (h
               + jnp.dot(ff.astype(jnp.bfloat16), w2_ref[0],
                         preferred_element_type=jnp.float32)
               + b2_ref[0])

        e_sc[pl.ds(row0, tile_n), :] = out

        @pl.when(l == num_layers)
        def _write_final():
            ent_ref[...] = out


# ----------------------------------------------------------------------------
# pallas_call wrapper — one launch for gate + all layers
# ----------------------------------------------------------------------------

def salt_fused(feat, prev_masked, adj_mask, params, *, tile_n=None):
    n, d = prev_masked.shape
    num_layers, _, three_a = params["Wqkv"].shape
    att_dim = three_a // 3
    hidden = params["W1"].shape[2]
    f_dim = feat.shape[1]

    if tile_n is None:
        tile_n = min(n, 128)
    assert num_layers >= 1, "need at least one RelationTrans layer"
    assert n % tile_n == 0 and tile_n % 16 == 0, "tile_n must divide N, %16==0"
    # lane-dense feature dims (review item): keeps stores unmasked and the
    # Q|K|V slices on 128-lane boundaries.
    assert d % 128 == 0 and att_dim % 128 == 0 and hidden % 128 == 0

    num_tiles = n // tile_n
    last_r = num_tiles - 1
    scale = 1.0 / math.sqrt(att_dim)

    kernel = functools.partial(_salt_fused_kernel, att_dim=att_dim,
                               tile_n=tile_n, num_layers=num_layers,
                               scale=scale)

    # ---- index maps ----------------------------------------------------------
    # step-0-only inputs: row blocks during l==0, then clamp to the last block
    # (same index -> no re-fetch, only one small tile stays resident).
    step0_rows = lambda l, r: (jnp.where(l == 0, r, last_r), 0)
    const2 = lambda l, r: (0, 0)
    const3 = lambda l, r: (0, 0, 0)
    mask_rows = lambda l, r: (jnp.where(l == 0, 0, r), 0)
    layer3 = lambda l, r: (jnp.maximum(l - 1, 0), 0, 0)

    in_specs = [
        pl.BlockSpec((tile_n, f_dim), step0_rows),        # feat
        pl.BlockSpec((tile_n, d), step0_rows),            # prev (masked)
        pl.BlockSpec((f_dim, d), const2),                 # Win
        pl.BlockSpec((2, d, d), const3),                  # Wg (stacked)
        pl.BlockSpec((1, d), const2),                     # bg
        pl.BlockSpec((tile_n, n), mask_rows),             # additive adj mask
        pl.BlockSpec((1, d, three_a), layer3),            # Wqkv
        pl.BlockSpec((1, att_dim, d), layer3),            # Wo
        pl.BlockSpec((1, d, hidden), layer3),             # W1
        pl.BlockSpec((1, 1, hidden), layer3),             # b1
        pl.BlockSpec((1, hidden, d), layer3),             # W2
        pl.BlockSpec((1, 1, d), layer3),                  # b2
    ]
    # ent: only written (and written back) at the final layer; mem: only at l==0
    # (clamped indices keep every output block's visit run consecutive).
    out_specs = (
        pl.BlockSpec((tile_n, d),
                     lambda l, r: (jnp.where(l == num_layers, r, 0), 0)),
        pl.BlockSpec((tile_n, d),
                     lambda l, r: (jnp.where(l == 0, r, last_r), 0)),
    )

    # advisory cost estimate for the XLA scheduler
    flops = int(
        2 * n * f_dim * d + 4 * n * d * d
        + num_layers * (2 * n * d * three_a + 4 * n * n * att_dim
                        + 2 * n * att_dim * d + 4 * n * d * hidden))
    transcendentals = int(n * d + num_layers * (n * n + n))
    weight_keys = ("Win", "Wg", "bg", "Wqkv", "Wo", "W1", "b1", "W2", "b2")
    bytes_accessed = int(
        feat.size * feat.dtype.itemsize
        + prev_masked.size * prev_masked.dtype.itemsize
        + adj_mask.size * adj_mask.dtype.itemsize * num_layers
        + sum(int(params[k].size) * params[k].dtype.itemsize
              for k in weight_keys)
        + 2 * n * d * 4)

    return pl.pallas_call(
        kernel,
        grid=(num_layers + 1, num_tiles),
        out_shape=(jax.ShapeDtypeStruct((n, d), jnp.float32),   # ent_embs
                   jax.ShapeDtypeStruct((n, d), jnp.float32)),  # memory cells
        in_specs=in_specs,
        out_specs=out_specs,
        scratch_shapes=[
            pltpu.VMEM((n, d), jnp.float32),          # activation carry
            pltpu.VMEM((n, three_a), jnp.bfloat16),   # per-layer Q|K|V cache
        ],
        compiler_params=pltpu.CompilerParams(
            dimension_semantics=("arbitrary", "arbitrary"),
            vmem_limit_bytes=48 * 1024 * 1024),
        cost_estimate=pl.CostEstimate(flops=flops,
                                      transcendentals=transcendentals,
                                      bytes_accessed=bytes_accessed),
    )(feat, prev_masked, params["Win"], params["Wg"], params["bg"], adj_mask,
      params["Wqkv"], params["Wo"], params["W1"], params["b1"],
      params["W2"], params["b2"])


# ----------------------------------------------------------------------------
# SalT model (glue in plain JAX, everything hot inside the single Pallas call)
# ----------------------------------------------------------------------------

def _xavier(key, shape, gain=math.sqrt(2.0)):
    fan_in, fan_out = shape[-2], shape[-1]
    limit = gain * math.sqrt(6.0 / (fan_in + fan_out))
    return jax.random.uniform(key, shape, jnp.float32, -limit, limit)


def make_salt_params(key, *, num_ent, num_rel, ent_dim, att_dim, hidden_dim,
                     num_layers):
    keys = jax.random.split(key, 4 + 6 * num_layers)
    win = _xavier(keys[1], (2 * num_rel, ent_dim))            # Linear, no bias
    wgx = _xavier(keys[2], (ent_dim, ent_dim))                # AdaptiveGate
    wgh = _xavier(keys[3], (ent_dim, ent_dim))

    wqkv_l, wo_l, w1_l, w2_l = [], [], [], []
    k = 4
    for _ in range(num_layers):
        wq = _xavier(keys[k + 0], (ent_dim, att_dim))
        wk = _xavier(keys[k + 1], (ent_dim, att_dim))
        wv = _xavier(keys[k + 2], (ent_dim, att_dim))
        wqkv_l.append(jnp.concatenate([wq, wk, wv], axis=1))  # [D, 3A]
        wo_l.append(_xavier(keys[k + 3], (att_dim, ent_dim)))
        w1_l.append(_xavier(keys[k + 4], (ent_dim, hidden_dim)))
        w2_l.append(_xavier(keys[k + 5], (hidden_dim, ent_dim)))
        k += 6

    params = {
        "rel_embs": _xavier(keys[0], (num_rel, ent_dim)),     # unused in fwd
        # bf16 weights: MXU-friendly operands, half the HBM->VMEM bytes
        "Win": win.astype(jnp.bfloat16),
        "Wg": jnp.stack([wgx, wgh]).astype(jnp.bfloat16),             # [2,D,D]
        "bg": jnp.zeros((1, ent_dim), jnp.float32),
        "Wqkv": jnp.stack(wqkv_l).astype(jnp.bfloat16),               # [L,D,3A]
        "Wo": jnp.stack(wo_l).astype(jnp.bfloat16),                   # [L,A,D]
        "W1": jnp.stack(w1_l).astype(jnp.bfloat16),                   # [L,D,H]
        "b1": jnp.zeros((num_layers, 1, hidden_dim), jnp.float32),    # [L,1,H]
        "W2": jnp.stack(w2_l).astype(jnp.bfloat16),                   # [L,H,D]
        "b2": jnp.zeros((num_layers, 1, ent_dim), jnp.float32),       # [L,1,D]
        "memory_cells": jnp.zeros((num_ent, ent_dim), jnp.float32),
    }
    return params


def salt_forward(params, ent_relational_features, batch_ent_idxs,
                 relational_adj_matrix, re_ratio, perm_key, *, tile_n=None):
    """Mirrors SalT.forward.  Returns (ent_embs, updated_memory_cells)."""
    n = ent_relational_features.shape[0]

    # memory lookup + keep-mask for random re-initialization (tiny XLA glue);
    # mask folded into prev here (matches `previous_ent_embs[re_idxs] *= 0`).
    prev = params["memory_cells"][batch_ent_idxs]
    num_re = int(n * re_ratio)
    re_idxs = jax.random.permutation(perm_key, n)[:num_re]
    keep_mask = jnp.ones((n, 1), jnp.float32).at[re_idxs].set(0.0)
    prev_masked = prev * keep_mask

    # additive attention mask precomputed ONCE (bf16): 0 where edge, -1e9 else
    adj_mask = jnp.where(relational_adj_matrix > 0, 0.0,
                         -1e9).astype(jnp.bfloat16)

    # single fused Pallas launch: gate (l=0) + all RelationTrans layers
    ent_embs, gated_mem = salt_fused(ent_relational_features, prev_masked,
                                     adj_mask, params, tile_n=tile_n)

    new_memory = params["memory_cells"].at[batch_ent_idxs].set(gated_mem)
    return ent_embs, new_memory


# ----------------------------------------------------------------------------
# demo
# ----------------------------------------------------------------------------

if __name__ == "__main__":
    NUM_ENT, NUM_REL = 64, 4
    ENT_DIM, ATT_DIM, HIDDEN_DIM, NUM_LAYERS = 128, 128, 256, 2
    BATCH = 32
    TILE_N = 16           # 2 query-row tiles -> exercises the row-tiled path
    RE_RATIO = 0.25

    root = jax.random.PRNGKey(0)
    k_par, k_feat, k_adj, k_idx, k_perm, k_mem = jax.random.split(root, 6)

    params = make_salt_params(
        k_par, num_ent=NUM_ENT, num_rel=NUM_REL, ent_dim=ENT_DIM,
        att_dim=ATT_DIM, hidden_dim=HIDDEN_DIM, num_layers=NUM_LAYERS)
    # give memory cells some non-zero history so the gate path is exercised
    params["memory_cells"] = 0.1 * jax.random.normal(
        k_mem, (NUM_ENT, ENT_DIM), jnp.float32)

    ent_relational_features = jnp.abs(
        jax.random.normal(k_feat, (BATCH, 2 * NUM_REL), jnp.float32))
    batch_ent_idxs = jax.random.permutation(k_idx, NUM_ENT)[:BATCH]

    # relational adjacency collapsed to [BATCH, BATCH] (glue), self-loops added
    adj = (jax.random.uniform(k_adj, (BATCH, BATCH)) > 0.5).astype(jnp.float32)
    adj = jnp.maximum(adj, jnp.eye(BATCH, dtype=jnp.float32))

    ent_embs, new_memory = salt_forward(
        params, ent_relational_features, batch_ent_idxs, adj, RE_RATIO, k_perm,
        tile_n=TILE_N)

    jax.block_until_ready((ent_embs, new_memory))
    assert ent_embs.shape == (BATCH, ENT_DIM)
    assert new_memory.shape == (NUM_ENT, ENT_DIM)
    assert bool(jnp.all(jnp.isfinite(ent_embs)))
    assert bool(jnp.all(jnp.isfinite(new_memory)))
    print("KERNEL_OK")
</pallas_src>

<mosaic_0001>
module attributes {stable_mosaic.version = 11 : i64} {
  func.func @_salt_fused_kernel(%arg0: i32, %arg1: i32, %arg2: memref<16x8xf32, #tpu.memory_space<vmem>>, %arg3: memref<16x128xf32, #tpu.memory_space<vmem>>, %arg4: memref<8x128xbf16, #tpu.memory_space<vmem>>, %arg5: memref<2x128x128xbf16, #tpu.memory_space<vmem>>, %arg6: memref<1x128xf32, #tpu.memory_space<vmem>>, %arg7: memref<16x32xbf16, #tpu.memory_space<vmem>>, %arg8: memref<1x128x384xbf16, #tpu.memory_space<vmem>>, %arg9: memref<1x128x128xbf16, #tpu.memory_space<vmem>>, %arg10: memref<1x128x256xbf16, #tpu.memory_space<vmem>>, %arg11: memref<1x1x256xf32, #tpu.memory_space<vmem>>, %arg12: memref<1x256x128xbf16, #tpu.memory_space<vmem>>, %arg13: memref<1x1x128xf32, #tpu.memory_space<vmem>>, %arg14: memref<16x128xf32, #tpu.memory_space<vmem>>, %arg15: memref<16x128xf32, #tpu.memory_space<vmem>>, %arg16: memref<32x128xf32, #tpu.memory_space<vmem>>, %arg17: memref<32x384xbf16, #tpu.memory_space<vmem>>) attributes {dimension_semantics = [#tpu.dimension_semantics<arbitrary>, #tpu.dimension_semantics<arbitrary>], iteration_bounds = array<i64: 3, 2>, scalar_prefetch = 0 : i64, scratch_operands = 2 : i64, tpu.core_type = #tpu.core_type<tc>, window_params = [{transform_indices = @transform_0, window_bounds = array<i64: 16, 8>}, {transform_indices = @transform_1, window_bounds = array<i64: 16, 128>}, {pipeline_mode = #tpu.pipeline_mode<synchronous>, transform_indices = @transform_2, window_bounds = array<i64: 8, 128>}, {pipeline_mode = #tpu.pipeline_mode<synchronous>, transform_indices = @transform_3, window_bounds = array<i64: 2, 128, 128>}, {pipeline_mode = #tpu.pipeline_mode<synchronous>, transform_indices = @transform_4, window_bounds = array<i64: 1, 128>}, {transform_indices = @transform_5, window_bounds = array<i64: 16, 32>}, {transform_indices = @transform_6, window_bounds = array<i64: 1, 128, 384>}, {transform_indices = @transform_7, window_bounds = array<i64: 1, 128, 128>}, {transform_indices = @transform_8, window_bounds = array<i64: 1, 128, 256>}, {transform_indices = @transform_9, window_bounds = array<i64: 1, 1, 256>}, {transform_indices = @transform_10, window_bounds = array<i64: 1, 256, 128>}, {transform_indices = @transform_11, window_bounds = array<i64: 1, 1, 128>}, {transform_indices = @transform_12, window_bounds = array<i64: 16, 128>}, {transform_indices = @transform_13, window_bounds = array<i64: 16, 128>}]} {
    %c16_i32 = arith.constant 16 : i32
    %0 = arith.muli %arg1, %c16_i32 : i32
    %1 = tpu.assume_multiple %0, 16 : i32
    %c0_i32 = arith.constant 0 : i32
    %2 = arith.cmpi eq, %arg0, %c0_i32 : i32
    %3 = arith.extui %2 : i1 to i32
    %c0_i32_0 = arith.constant 0 : i32
    %4 = arith.cmpi ne, %3, %c0_i32_0 : i32
    scf.if %4 {
      %c0 = arith.constant 0 : index
      %c0_3 = arith.constant 0 : index
      %8 = vector.load %arg2[%c0, %c0_3] : memref<16x8xf32, #tpu.memory_space<vmem>>, vector<16x8xf32>
      %9 = math.absf %8 : vector<16x8xf32>
      %cst = arith.constant dense<0.000000e+00> : vector<16xf32>
      %10 = vector.multi_reduction <add>, %9, %cst [1] : vector<16x8xf32> to vector<16xf32>
      %11 = vector.shape_cast %10 : vector<16xf32> to vector<16x1xf32>
      %cst_4 = arith.constant 9.99999996E-13 : f32
      %12 = vector.broadcast %cst_4 : f32 to vector<16x1xf32>
      %13 = arith.maximumf %11, %12 : vector<16x1xf32>
      %14 = vector.broadcast %13 : vector<16x1xf32> to vector<16x8xf32>
      %15 = arith.divf %8, %14 : vector<16x8xf32>
      %16 = arith.truncf %15 : vector<16x8xf32> to vector<16x8xbf16>
      %c0_5 = arith.constant 0 : index
      %c0_6 = arith.constant 0 : index
      %17 = vector.load %arg4[%c0_5, %c0_6] : memref<8x128xbf16, #tpu.memory_space<vmem>>, vector<8x128xbf16>
      %cst_7 = arith.constant dense<0.000000e+00> : vector<16x128xf32>
      %18 = tpu.matmul %16, %17, %cst_7 {dimension_numbers = #tpu.dot_dimension_numbers<[1], [0], [0], [1], [0, 0, 1, 1], [], []>} : vector<16x8xbf16>, vector<8x128xbf16>, vector<16x128xf32> -> vector<16x128xf32>
      %c0_8 = arith.constant 0 : index
      %c0_9 = arith.constant 0 : index
      %19 = vector.load %arg3[%c0_8, %c0_9] : memref<16x128xf32, #tpu.memory_space<vmem>>, vector<16x128xf32>
      %20 = arith.truncf %18 : vector<16x128xf32> to vector<16x128xbf16>
      %c0_10 = arith.constant 0 : index
      %c0_11 = arith.constant 0 : index
      %c0_12 = arith.constant 0 : index
      %21 = vector.load %arg5[%c0_10, %c0_11, %c0_12] : memref<2x128x128xbf16, #tpu.memory_space<vmem>>, vector<1x128x128xbf16>
      %22 = vector.shape_cast %21 : vector<1x128x128xbf16> to vector<128x128xbf16>
      %cst_13 = arith.constant dense<0.000000e+00> : vector<16x128xf32>
      %23 = tpu.matmul %20, %22, %cst_13 {dimension_numbers = #tpu.dot_dimension_numbers<[1], [0], [0], [1], [0, 0, 1, 1], [], []>} : vector<16x128xbf16>, vector<128x128xbf16>, vector<16x128xf32> -> vector<16x128xf32>
      %24 = arith.truncf %19 : vector<16x128xf32> to vector<16x128xbf16>
      %c1 = arith.constant 1 : index
      %c0_14 = arith.constant 0 : index
      %c0_15 = arith.constant 0 : index
      %25 = vector.load %arg5[%c1, %c0_14, %c0_15] : memref<2x128x128xbf16, #tpu.memory_space<vmem>>, vector<1x128x128xbf16>
      %26 = vector.shape_cast %25 : vector<1x128x128xbf16> to vector<128x128xbf16>
      %cst_16 = arith.constant dense<0.000000e+00> : vector<16x128xf32>
      %27 = tpu.matmul %24, %26, %cst_16 {dimension_numbers = #tpu.dot_dimension_numbers<[1], [0], [0], [1], [0, 0, 1, 1], [], []>} : vector<16x128xbf16>, vector<128x128xbf16>, vector<16x128xf32> -> vector<16x128xf32>
      %28 = arith.addf %23, %27 : vector<16x128xf32>
      %c0_17 = arith.constant 0 : index
      %c0_18 = arith.constant 0 : index
      %29 = vector.load %arg6[%c0_17, %c0_18] : memref<1x128xf32, #tpu.memory_space<vmem>>, vector<1x128xf32>
      %30 = vector.broadcast %29 : vector<1x128xf32> to vector<16x128xf32>
      %31 = arith.addf %28, %30 : vector<16x128xf32>
      %32 = arith.negf %31 : vector<16x128xf32>
      %33 = math.exp %32 : vector<16x128xf32>
      %cst_19 = arith.constant 1.000000e+00 : f32
      %34 = vector.broadcast %cst_19 : f32 to vector<16x128xf32>
      %35 = arith.addf %34, %33 : vector<16x128xf32>
      %36 = arith.divf %34, %35 : vector<16x128xf32>
      %37 = arith.mulf %36, %18 : vector<16x128xf32>
      %cst_20 = arith.constant 1.000000e+00 : f32
      %38 = vector.broadcast %cst_20 : f32 to vector<16x128xf32>
      %39 = arith.subf %38, %36 : vector<16x128xf32>
      %40 = arith.mulf %39, %19 : vector<16x128xf32>
      %41 = arith.addf %37, %40 : vector<16x128xf32>
      %42 = arith.index_cast %1 : i32 to index
      %c0_21 = arith.constant 0 : index
      %43 = vector.load %arg16[%42, %c0_21] : memref<32x128xf32, #tpu.memory_space<vmem>>, vector<16x128xf32>
      tpu.vector_store %arg16[%42, %c0_21], %41 {strides = array<i32>} : memref<32x128xf32, #tpu.memory_space<vmem>>, vector<16x128xf32>,
      %c0_22 = arith.constant 0 : index
      %c0_23 = arith.constant 0 : index
      %44 = vector.load %arg15[%c0_22, %c0_23] : memref<16x128xf32, #tpu.memory_space<vmem>>, vector<16x128xf32>
      tpu.vector_store %arg15[%c0_22, %c0_23], %41 {strides = array<i32>} : memref<16x128xf32, #tpu.memory_space<vmem>>, vector<16x128xf32>,
    } else {
    }
    %c0_i32_1 = arith.constant 0 : i32
    %5 = arith.cmpi sgt, %arg0, %c0_i32_1 : i32
    %6 = arith.extui %5 : i1 to i32
    %c0_i32_2 = arith.constant 0 : i32
    %7 = arith.cmpi ne, %6, %c0_i32_2 : i32
    scf.if %7 {
      %c0_i32_3 = arith.constant 0 : i32
      %8 = arith.cmpi eq, %arg1, %c0_i32_3 : i32
      %9 = arith.extui %8 : i1 to i32
      %c0_i32_4 = arith.constant 0 : i32
      %10 = arith.cmpi ne, %9, %c0_i32_4 : i32
      scf.if %10 {
        %c0_35 = arith.constant 0 : index
        %c0_36 = arith.constant 0 : index
        %65 = vector.load %arg16[%c0_35, %c0_36] : memref<32x128xf32, #tpu.memory_space<vmem>>, vector<32x128xf32>
        %66 = arith.truncf %65 : vector<32x128xf32> to vector<32x128xbf16>
        %c0_37 = arith.constant 0 : index
        %c0_38 = arith.constant 0 : index
        %c0_39 = arith.constant 0 : index
        %67 = vector.load %arg8[%c0_37, %c0_38, %c0_39] : memref<1x128x384xbf16, #tpu.memory_space<vmem>>, vector<1x128x384xbf16>
        %68 = vector.shape_cast %67 : vector<1x128x384xbf16> to vector<128x384xbf16>
        %cst_40 = arith.constant dense<0.000000e+00> : vector<32x384xf32>
        %69 = tpu.matmul %66, %68, %cst_40 {dimension_numbers = #tpu.dot_dimension_numbers<[1], [0], [0], [1], [0, 0, 1, 1], [], []>} : vector<32x128xbf16>, vector<128x384xbf16>, vector<32x384xf32> -> vector<32x384xf32>
        %70 = arith.truncf %69 : vector<32x384xf32> to vector<32x384xbf16>
        %c0_41 = arith.constant 0 : index
        %c0_42 = arith.constant 0 : index
        %71 = vector.load %arg17[%c0_41, %c0_42] : memref<32x384xbf16, #tpu.memory_space<vmem>>, vector<32x384xbf16>
        tpu.vector_store %arg17[%c0_41, %c0_42], %70 {strides = array<i32>} : memref<32x384xbf16, #tpu.memory_space<vmem>>, vector<32x384xbf16>,
      } else {
      }
      %11 = arith.index_cast %1 : i32 to index
      %c0 = arith.constant 0 : index
      %12 = vector.load %arg16[%11, %c0] : memref<32x128xf32, #tpu.memory_space<vmem>>, vector<16x128xf32>
      %13 = arith.index_cast %1 : i32 to index
      %c0_5 = arith.constant 0 : index
      %14 = vector.load %arg17[%13, %c0_5] : memref<32x384xbf16, #tpu.memory_space<vmem>>, vector<16x384xbf16>
      %15 = vector.extract_strided_slice %14 {offsets = [0, 0], sizes = [16, 128], strides = [1, 1]} : vector<16x384xbf16> to vector<16x128xbf16>
      %c0_6 = arith.constant 0 : index
      %c128 = arith.constant 128 : index
      %16 = vector.load %arg17[%c0_6, %c128] : memref<32x384xbf16, #tpu.memory_space<vmem>>, vector<32x128xbf16>
      %c0_7 = arith.constant 0 : index
      %c256 = arith.constant 256 : index
      %17 = vector.load %arg17[%c0_7, %c256] : memref<32x384xbf16, #tpu.memory_space<vmem>>, vector<32x128xbf16>
      %cst = arith.constant dense<0.000000e+00> : vector<16x32xf32>
      %18 = tpu.matmul %15, %16, %cst {dimension_numbers = #tpu.dot_dimension_numbers<[1], [1], [0], [0], [0, 0, 1, 0], [], []>} : vector<16x128xbf16>, vector<32x128xbf16>, vector<16x32xf32> -> vector<16x32xf32>
      %cst_8 = arith.constant 0.0883883461 : f32
      %19 = vector.broadcast %cst_8 : f32 to vector<16x32xf32>
      %20 = arith.mulf %18, %19 : vector<16x32xf32>
      %c0_9 = arith.constant 0 : index
      %c0_10 = arith.constant 0 : index
      %21 = vector.load %arg7[%c0_9, %c0_10] : memref<16x32xbf16, #tpu.memory_space<vmem>>, vector<16x32xbf16>
      %22 = arith.extf %21 : vector<16x32xbf16> to vector<16x32xf32>
      %23 = arith.addf %20, %22 : vector<16x32xf32>
      %cst_11 = arith.constant dense<0xFF800000> : vector<16xf32>
      %24 = vector.multi_reduction <maximumf>, %23, %cst_11 [1] : vector<16x32xf32> to vector<16xf32>
      %25 = vector.shape_cast %24 : vector<16xf32> to vector<16x1xf32>
      %26 = vector.broadcast %25 : vector<16x1xf32> to vector<16x32xf32>
      %27 = arith.subf %23, %26 : vector<16x32xf32>
      %28 = math.exp %27 : vector<16x32xf32>
      %cst_12 = arith.constant dense<0.000000e+00> : vector<16xf32>
      %29 = vector.multi_reduction <add>, %28, %cst_12 [1] : vector<16x32xf32> to vector<16xf32>
      %30 = vector.shape_cast %29 : vector<16xf32> to vector<16x1xf32>
      %31 = tpu.reciprocal %30 {approx = true} : vector<16x1xf32> -> vector<16x1xf32>
      %32 = vector.broadcast %31 : vector<16x1xf32> to vector<16x32xf32>
      %33 = arith.mulf %28, %32 : vector<16x32xf32>
      %34 = arith.truncf %33 : vector<16x32xf32> to vector<16x32xbf16>
      %cst_13 = arith.constant dense<0.000000e+00> : vector<16x128xf32>
      %35 = tpu.matmul %34, %17, %cst_13 {dimension_numbers = #tpu.dot_dimension_numbers<[1], [0], [0], [1], [0, 0, 1, 1], [], []>} : vector<16x32xbf16>, vector<32x128xbf16>, vector<16x128xf32> -> vector<16x128xf32>
      %36 = arith.truncf %35 : vector<16x128xf32> to vector<16x128xbf16>
      %c0_14 = arith.constant 0 : index
      %c0_15 = arith.constant 0 : index
      %c0_16 = arith.constant 0 : index
      %37 = vector.load %arg9[%c0_14, %c0_15, %c0_16] : memref<1x128x128xbf16, #tpu.memory_space<vmem>>, vector<1x128x128xbf16>
      %38 = vector.shape_cast %37 : vector<1x128x128xbf16> to vector<128x128xbf16>
      %cst_17 = arith.constant dense<0.000000e+00> : vector<16x128xf32>
      %39 = tpu.matmul %36, %38, %cst_17 {dimension_numbers = #tpu.dot_dimension_numbers<[1], [0], [0], [1], [0, 0, 1, 1], [], []>} : vector<16x128xbf16>, vector<128x128xbf16>, vector<16x128xf32> -> vector<16x128xf32>
      %40 = arith.addf %12, %39 : vector<16x128xf32>
      %41 = arith.truncf %40 : vector<16x128xf32> to vector<16x128xbf16>
      %c0_18 = arith.constant 0 : index
      %c0_19 = arith.constant 0 : index
      %c0_20 = arith.constant 0 : index
      %42 = vector.load %arg10[%c0_18, %c0_19, %c0_20] : memref<1x128x256xbf16, #tpu.memory_space<vmem>>, vector<1x128x256xbf16>
      %43 = vector.shape_cast %42 : vector<1x128x256xbf16> to vector<128x256xbf16>
      %cst_21 = arith.constant dense<0.000000e+00> : vector<16x256xf32>
      %44 = tpu.matmul %41, %43, %cst_21 {dimension_numbers = #tpu.dot_dimension_numbers<[1], [0], [0], [1], [0, 0, 1, 1], [], []>} : vector<16x128xbf16>, vector<128x256xbf16>, vector<16x256xf32> -> vector<16x256xf32>
      %c0_22 = arith.constant 0 : index
      %c0_23 = arith.constant 0 : index
      %c0_24 = arith.constant 0 : index
      %45 = vector.load %arg11[%c0_22, %c0_23, %c0_24] : memref<1x1x256xf32, #tpu.memory_space<vmem>>, vector<1x1x256xf32>
      %46 = vector.shape_cast %45 : vector<1x1x256xf32> to vector<1x256xf32>
      %47 = vector.broadcast %46 : vector<1x256xf32> to vector<16x256xf32>
      %48 = arith.addf %44, %47 : vector<16x256xf32>
      %cst_25 = arith.constant 0.000000e+00 : f32
      %49 = vector.broadcast %cst_25 : f32 to vector<16x256xf32>
      %50 = arith.maximumf %48, %49 : vector<16x256xf32>
      %51 = arith.truncf %50 : vector<16x256xf32> to vector<16x256xbf16>
      %c0_26 = arith.constant 0 : index
      %c0_27 = arith.constant 0 : index
      %c0_28 = arith.constant 0 : index
      %52 = vector.load %arg12[%c0_26, %c0_27, %c0_28] : memref<1x256x128xbf16, #tpu.memory_space<vmem>>, vector<1x256x128xbf16>
      %53 = vector.shape_cast %52 : vector<1x256x128xbf16> to vector<256x128xbf16>
      %cst_29 = arith.constant dense<0.000000e+00> : vector<16x128xf32>
      %54 = tpu.matmul %51, %53, %cst_29 {dimension_numbers = #tpu.dot_dimension_numbers<[1], [0], [0], [1], [0, 0, 1, 1], [], []>} : vector<16x256xbf16>, vector<256x128xbf16>, vector<16x128xf32> -> vector<16x128xf32>
      %55 = arith.addf %40, %54 : vector<16x128xf32>
      %c0_30 = arith.constant 0 : index
      %c0_31 = arith.constant 0 : index
      %c0_32 = arith.constant 0 : index
      %56 = vector.load %arg13[%c0_30, %c0_31, %c0_32] : memref<1x1x128xf32, #tpu.memory_space<vmem>>, vector<1x1x128xf32>
      %57 = vector.shape_cast %56 : vector<1x1x128xf32> to vector<1x128xf32>
      %58 = vector.broadcast %57 : vector<1x128xf32> to vector<16x128xf32>
      %59 = arith.addf %55, %58 : vector<16x128xf32>
      %60 = arith.index_cast %1 : i32 to index
      %c0_33 = arith.constant 0 : index
      %61 = vector.load %arg16[%60, %c0_33] : memref<32x128xf32, #tpu.memory_space<vmem>>, vector<16x128xf32>
      tpu.vector_store %arg16[%60, %c0_33], %59 {strides = array<i32>} : memref<32x128xf32, #tpu.memory_space<vmem>>, vector<16x128xf32>,
      %c2_i32 = arith.constant 2 : i32
      %62 = arith.cmpi eq, %arg0, %c2_i32 : i32
      %63 = arith.extui %62 : i1 to i32
      %c0_i32_34 = arith.constant 0 : i32
      %64 = arith.cmpi ne, %63, %c0_i32_34 : i32
      scf.if %64 {
        %c0_35 = arith.constant 0 : index
        %c0_36 = arith.constant 0 : index
        %65 = vector.load %arg14[%c0_35, %c0_36] : memref<16x128xf32, #tpu.memory_space<vmem>>, vector<16x128xf32>
        tpu.vector_store %arg14[%c0_35, %c0_36], %59 {strides = array<i32>} : memref<16x128xf32, #tpu.memory_space<vmem>>, vector<16x128xf32>,
      } else {
      }
    } else {
    }
    return
  }
  func.func @transform_0(%arg0: i32, %arg1: i32) -> (i32, i32) {
    %c0_i32 = arith.constant 0 : i32
    %0 = arith.cmpi eq, %arg0, %c0_i32 : i32
    %c1_i32 = arith.constant 1 : i32
    %1 = arith.select %0, %arg1, %c1_i32 : i32
    %c0_i32_0 = arith.constant 0 : i32
    %c0_i32_1 = arith.constant 0 : i32
    return %1, %c0_i32_0 : i32, i32
  }
  func.func @transform_1(%arg0: i32, %arg1: i32) -> (i32, i32) {
    %c0_i32 = arith.constant 0 : i32
    %0 = arith.cmpi eq, %arg0, %c0_i32 : i32
    %c1_i32 = arith.constant 1 : i32
    %1 = arith.select %0, %arg1, %c1_i32 : i32
    %c0_i32_0 = arith.constant 0 : i32
    %c0_i32_1 = arith.constant 0 : i32
    return %1, %c0_i32_0 : i32, i32
  }
  func.func @transform_2(%arg0: i32, %arg1: i32) -> (i32, i32) {
    %c0_i32 = arith.constant 0 : i32
    %c0_i32_0 = arith.constant 0 : i32
    %c0_i32_1 = arith.constant 0 : i32
    return %c0_i32, %c0_i32_0 : i32, i32
  }
  func.func @transform_3(%arg0: i32, %arg1: i32) -> (i32, i32, i32) {
    %c0_i32 = arith.constant 0 : i32
    %c0_i32_0 = arith.constant 0 : i32
    %c0_i32_1 = arith.constant 0 : i32
    %c0_i32_2 = arith.constant 0 : i32
    return %c0_i32, %c0_i32_0, %c0_i32_1 : i32, i32, i32
  }
  func.func @transform_4(%arg0: i32, %arg1: i32) -> (i32, i32) {
    %c0_i32 = arith.constant 0 : i32
    %c0_i32_0 = arith.constant 0 : i32
    %c0_i32_1 = arith.constant 0 : i32
    return %c0_i32, %c0_i32_0 : i32, i32
  }
  func.func @transform_5(%arg0: i32, %arg1: i32) -> (i32, i32) {
    %c0_i32 = arith.constant 0 : i32
    %0 = arith.cmpi eq, %arg0, %c0_i32 : i32
    %c0_i32_0 = arith.constant 0 : i32
    %1 = arith.select %0, %c0_i32_0, %arg1 : i32
    %c0_i32_1 = arith.constant 0 : i32
    %c0_i32_2 = arith.constant 0 : i32
    return %1, %c0_i32_1 : i32, i32
  }
  func.func @transform_6(%arg0: i32, %arg1: i32) -> (i32, i32, i32) {
    %c1_i32 = arith.constant 1 : i32
    %0 = arith.subi %arg0, %c1_i32 : i32
    %c0_i32 = arith.constant 0 : i32
    %1 = arith.maxsi %0, %c0_i32 : i32
    %c0_i32_0 = arith.constant 0 : i32
    %c0_i32_1 = arith.constant 0 : i32
    %c0_i32_2 = arith.constant 0 : i32
    return %1, %c0_i32_0, %c0_i32_1 : i32, i32, i32
  }
  func.func @transform_7(%arg0: i32, %arg1: i32) -> (i32, i32, i32) {
    %c1_i32 = arith.constant 1 : i32
    %0 = arith.subi %arg0, %c1_i32 : i32
    %c0_i32 = arith.constant 0 : i32
    %1 = arith.maxsi %0, %c0_i32 : i32
    %c0_i32_0 = arith.constant 0 : i32
    %c0_i32_1 = arith.constant 0 : i32
    %c0_i32_2 = arith.constant 0 : i32
    return %1, %c0_i32_0, %c0_i32_1 : i32, i32, i32
  }
  func.func @transform_8(%arg0: i32, %arg1: i32) -> (i32, i32, i32) {
    %c1_i32 = arith.constant 1 : i32
    %0 = arith.subi %arg0, %c1_i32 : i32
    %c0_i32 = arith.constant 0 : i32
    %1 = arith.maxsi %0, %c0_i32 : i32
    %c0_i32_0 = arith.constant 0 : i32
    %c0_i32_1 = arith.constant 0 : i32
    %c0_i32_2 = arith.constant 0 : i32
    return %1, %c0_i32_0, %c0_i32_1 : i32, i32, i32
  }
  func.func @transform_9(%arg0: i32, %arg1: i32) -> (i32, i32, i32) {
    %c1_i32 = arith.constant 1 : i32
    %0 = arith.subi %arg0, %c1_i32 : i32
    %c0_i32 = arith.constant 0 : i32
    %1 = arith.maxsi %0, %c0_i32 : i32
    %c0_i32_0 = arith.constant 0 : i32
    %c0_i32_1 = arith.constant 0 : i32
    %c0_i32_2 = arith.constant 0 : i32
    return %1, %c0_i32_0, %c0_i32_1 : i32, i32, i32
  }
  func.func @transform_10(%arg0: i32, %arg1: i32) -> (i32, i32, i32) {
    %c1_i32 = arith.constant 1 : i32
    %0 = arith.subi %arg0, %c1_i32 : i32
    %c0_i32 = arith.constant 0 : i32
    %1 = arith.maxsi %0, %c0_i32 : i32
    %c0_i32_0 = arith.constant 0 : i32
    %c0_i32_1 = arith.constant 0 : i32
    %c0_i32_2 = arith.constant 0 : i32
    return %1, %c0_i32_0, %c0_i32_1 : i32, i32, i32
  }
  func.func @transform_11(%arg0: i32, %arg1: i32) -> (i32, i32, i32) {
    %c1_i32 = arith.constant 1 : i32
    %0 = arith.subi %arg0, %c1_i32 : i32
    %c0_i32 = arith.constant 0 : i32
    %1 = arith.maxsi %0, %c0_i32 : i32
    %c0_i32_0 = arith.constant 0 : i32
    %c0_i32_1 = arith.constant 0 : i32
    %c0_i32_2 = arith.constant 0 : i32
    return %1, %c0_i32_0, %c0_i32_1 : i32, i32, i32
  }
  func.func @transform_12(%arg0: i32, %arg1: i32) -> (i32, i32) {
    %c2_i32 = arith.constant 2 : i32
    %0 = arith.cmpi eq, %arg0, %c2_i32 : i32
    %c0_i32 = arith.constant 0 : i32
    %1 = arith.select %0, %arg1, %c0_i32 : i32
    %c0_i32_0 = arith.constant 0 : i32
    %c0_i32_1 = arith.constant 0 : i32
    return %1, %c0_i32_0 : i32, i32
  }
  func.func @transform_13(%arg0: i32, %arg1: i32) -> (i32, i32) {
    %c0_i32 = arith.constant 0 : i32
    %0 = arith.cmpi eq, %arg0, %c0_i32 : i32
    %c1_i32 = arith.constant 1 : i32
    %1 = arith.select %0, %arg1, %c1_i32 : i32
    %c0_i32_0 = arith.constant 0 : i32
    %c0_i32_1 = arith.constant 0 : i32
    return %1, %c0_i32_0 : i32, i32
  }
}

</mosaic_0001>

<bundles_post_ra>
// kernel: tpu_custom_call.1
= control target key start
LH: loop header
LB: loop body
LE: loop exit
PB: predicated region body
PF: predicated region fallthrough
CT: control target
= control target key end

     0   :  { %s4173_s0 = inlined_call_operand.vmem [shape: f32[32,8], index: 0, kind: input, shape index: {}]   ;;  %s4174_s1 = inlined_call_operand.vmem [shape: f32[32,128], index: 1, kind: input, shape index: {}]   ;;  %s4175_s2 = inlined_call_operand.hbm [shape: bf16[8,128], index: 2, kind: input, shape index: {}]   ;;  %s4176_s3 = inlined_call_operand.hbm [shape: bf16[2,128,128], index: 3, kind: input, shape index: {}]   ;;  %s4177_s4 = inlined_call_operand.vmem [shape: f32[1,128], index: 4, kind: input, shape index: {}]   ;;  %s4178_s5 = inlined_call_operand.vmem [shape: bf16[32,32], index: 5, kind: input, shape index: {}]   ;;  %s4179_s6 = inlined_call_operand.hbm [shape: bf16[2,128,384], index: 6, kind: input, shape index: {}]   ;;  %s4180_s7 = inlined_call_operand.hbm [shape: bf16[2,128,128], index: 7, kind: input, shape index: {}]   ;;  %s4181_s8 = inlined_call_operand.hbm [shape: bf16[2,128,256], index: 8, kind: input, shape index: {}]   ;;  %s4182_s9 = inlined_call_operand.vmem [shape: f32[2,1,256], index: 9, kind: input, shape index: {}]   ;;  %s4183_s10 = inlined_call_operand.hbm [shape: bf16[2,256,128], index: 10, kind: input, shape index: {}]   ;;  %s4184_s11 = inlined_call_operand.vmem [shape: f32[2,1,128], index: 11, kind: input, shape index: {}]   ;;  %s4185_s12 = inlined_call_operand.hbm [shape: f32[32,128], index: 12, kind: output, shape index: {0}]   ;;  %s4186_s13 = inlined_call_operand.hbm [shape: f32[32,128], index: 13, kind: output, shape index: {1}]  }
   0x1   :  { %4228 = sst [smem:[#allocation41_spill]] %s4173_s0 }
   0x2   :  { %4229 = sst [smem:[#allocation42_spill]] %s4174_s1 }
   0x3   :  { %4230 = sst [smem:[#allocation43_spill]] %s4175_s2 }
   0x4   :  { %4231 = sst [smem:[#allocation44_spill]] %s4176_s3 }
   0x5   :  { %4232 = sst [smem:[#allocation45_spill]] %s4177_s4 }
   0x6   :  { %4233 = sst [smem:[#allocation46_spill]] %s4178_s5 }
   0x7   :  { %4234 = sst [smem:[#allocation47_spill]] %s4179_s6 }
   0x8   :  { %4235 = sst [smem:[#allocation48_spill]] %s4180_s7 }
   0x9   :  { %4236 = sst [smem:[#allocation49_spill]] %s4181_s8 }
   0xa   :  { %4237 = sst [smem:[#allocation50_spill]] %s4182_s9 }
   0xb   :  { %4238 = sst [smem:[#allocation51_spill]] %s4184_s11 }
   0xc   :  { %4239 = sst [smem:[#allocation52_spill]] %s4185_s12 }
   0xd   :  { %4240 = sst [smem:[#allocation53_spill]] %s4186_s13 }
   0xe   :  { %19 = vsyncpa [#allocation5], 0 }
   0xf   :  { %20 = vsyncpa [#allocation8], 0 }
  0x10   :  { %21 = vsyncpa [#allocation6], 0 }
  0x11   :  { %23 = vsyncpa [#allocation6 + $0x1], 0 }
  0x12   :  { %24 = vsyncpa [#allocation15], 0 }
  0x13   :  { %26 = vsyncpa [#allocation15 + $0x1], 0  ;;  %s3450_s25 = smov 0   ;;  %s3452_s26 = smov 0  }
  0x14   :  { %s3454_s27 = smov 0   ;;  %s3456_s28 = smov 0  }
  0x15   :  { %s3458_s29 = smov 0   ;;  %s3460_s30 = smov 0  }
  0x16   :  { %s3462_s14 = smov 0   ;;  %s3464_s15 = smov 0  }
  0x17   :  { %s3466_s16 = smov 0   ;;  %s3468_s17 = smov 0  }
  0x18   :  { %s3470_s18 = smov 0   ;;  %s3472_s19 = smov 0  }
  0x19   :  { %s3474_s20 = smov 0   ;;  %s3476_s21 = smov 0  }
  0x1a LB: > { %4241 = sst [smem:[#allocation21_spill]] %s3304_s25  ;;  %s3519_s22 = sadd.s32 4294967295, %s3356_s21   ;;  %s3356_s21 = sphi %s3476_s21, %s32_s21   ;;  %s3352_s20 = sphi %s3474_s20, %s4344_s20   ;;  %s3348_s19 = sphi %s3472_s19, %s4335_s19   ;;  %s3344_s18 = sphi %s3470_s18, %s4334_s18   ;;  %s3340_s17 = sphi %s3468_s17, %s4333_s17   ;;  %s3336_s16 = sphi %s3466_s16, %s4332_s16   ;;  %s3332_s15 = sphi %s3464_s15, %s4343_s15   ;;  %s3328_s14 = sphi %s3462_s14, %s4342_s14   ;;  %s3324_s30 = sphi %s3460_s30, %s4330_s30   ;;  %s3320_s29 = sphi %s3458_s29, %s4341_s29   ;;  %s3316_s28 = sphi %s3456_s28, %s4340_s28   ;;  %s3312_s27 = sphi %s3454_s27, %s4328_s27   ;;  %s3308_s26 = sphi %s3452_s26, %s4339_s26   ;;  %s3304_s25 = sphi %s3450_s25, %s4338_s25  }
  0x1b   : > { %4242 = sst [smem:[#allocation22_spill]] %s3312_s27  ;;  %s41_s24 = sadd.s32 1, %s3348_s19 }
  0x1c   : > { %4243 = sst [smem:[#allocation23_spill]] %s3316_s28  ;;  %s44_s13 = sadd.s32 1, %s3352_s20 }
  0x1d   : > { %4244 = sst [smem:[#allocation24_spill]] %s3324_s30  ;;  %p42_p0 = scmp.ge.s32.totalorder %s41_s24, 2 }
  0x1e   : > { %4245 = sst [smem:[#allocation25_spill]] %s3336_s16  ;;  %s2354_s12 = sadd.s32 4294967295, %s3352_s20 }
  0x1f   : > { %4246 = sst [smem:[#allocation26_spill]] %s3340_s17  ;;  %p202_p1 = scmp.gt.s32.totalorder %s2354_s12, 0 }
  0x20   : > { %4247 = sst [smem:[#allocation27_spill]] %s3344_s18  ;;  %s210_s4 = sadd.s32 1, %s3336_s16 }
  0x21   : > { %4248 = sst [smem:[#allocation28_spill]] %s3348_s19  ;;  %s4346_s24 = smov (%p42_p0, %s41_s24), 0 }
  0x22   : > { %4249 = sst [smem:[#allocation29_spill]] %s3352_s20  ;;  %s4348_s13 = smov (!%p42_p0, %s44_s13), %s3352_s20 }
  0x23   : > { %4250 = sst [smem:[#allocation30_spill]] %s3356_s21  ;;  %s4350_s12 = smov (!%p202_p1, %s2354_s12), 0 }
  0x24   : > { %4251 = sst [smem:[#allocation31_spill]] %s4346_s24  ;;  %p46_p2 = scmp.ge.s32.totalorder %s4348_s13, 3 }
  0x25   : > { %p217_p3 = scmp.ne.s32.totalorder %s3336_s16, %s3332_s15  ;;  %p218_p4 = scmp.eq.s32.totalorder %s3356_s21, 0 }
  0x26   : > { %p223_p5 = scmp.ne.s32.totalorder %s3332_s15, %s3328_s14  ;;  %s4352_s13 = smov (%p46_p2, %s4348_s13), 0 }
  0x27   : > { %4252 = sst [smem:[#allocation32_spill]] %s4352_s13  ;;  %p3537_p6 = por %p218_p4, %p217_p3 }
  0x28   : > { %p4195_p7 = scmp.eq.s32.totalorder %s3519_s22, 0  ;;  %s2355_s9 = sadd.s32 4294967295, %s4352_s13 }
  0x29   : > { %p393_p8 = scmp.eq.s32.totalorder %s3352_s20, 2  ;;  %p205_p9 = scmp.gt.s32.totalorder %s2355_s9, 0 }
  0x2a   : > { %p3546_p10 = por %p4195_p7, %p223_p5  ;;  %p395_p11 = scmp.eq.s32.totalorder %s4352_s13, 2 }
  0x2b   : > { %s394_s11 = scalar_select %p393_p8, %s3348_s19, 0 }
  0x2c   : > { %s4254_s14 = scalar_select %p3546_p10, 1, 0 }
  0x2d   : > { %s4354_s9 = smov (!%p205_p9, %s2355_s9), 0  ;;  %s400_s5 = sadd.s32 1, %s3324_s30 }
  0x2e   : > { %4255 = sst [smem:[#allocation33_spill]] %s4254_s14  ;;  %s207_s1 = ssub.s32 %s4350_s12, %s4354_s9 }
  0x2f   : > { %p410_p12 = scmp.ne.s32.totalorder %s3324_s30, %s3320_s29  ;;  %p208_p13 = scmp.eq.s32.totalorder %s207_s1, 0 }
  0x30   : > { %p411_p0 = scmp.eq.s32.totalorder %s3519_s22, 5  ;;  %p416_p3 = scmp.ne.s32.totalorder %s3320_s29, %s3316_s28 }
  0x31   : > { %s396_s0 = scalar_select %p395_p11, %s4346_s24, 0 }
  0x32   : > { %s3559_s17 = scalar_select %p208_p13, %s3336_s16, %s210_s4  }
  0x33   : > { %s397_s18 = ssub.s32 %s394_s11, %s396_s0  ;;  %p3563_p1 = por %p411_p0, %p410_p12 }
  0x34   : > { %4256 = sst [smem:[#allocation34_spill]] %s3559_s17  ;;  %p398_p2 = scmp.eq.s32.totalorder %s397_s18, 0 }
  0x35   : > { %s4257_s14 = scalar_select %p3563_p1, 1, 0 }
  0x36   : > { %s4259_s9 = sadd.s32 4294967294, %s3356_s21   ;;  %p423_p5 = scmp.eq.s32.totalorder %s3352_s20, 0 }
  0x37   : > { %4258 = sst [smem:[#allocation35_spill]] %s4257_s14  ;;  %p3571_p4 = scmp.eq.s32.totalorder %s4259_s9, 5 }
  0x38   : > { %s3577_s0 = scalar_select %p398_p2, %s3324_s30, %s400_s5  }
  0x39   : > { %p3581_p8 = por %p3571_p4, %p416_p3  ;;  %p425_p9 = scmp.eq.s32.totalorder %s4352_s13, 0 }
  0x3a   : > { %4261 = sst [smem:[#allocation36_spill]] %s3577_s0  ;;  %s430_s17 = sadd.s32 1, %s3312_s27 }
  0x3b   : > { %s4262_s4 = scalar_select %p3581_p8, 1, 0 }
  0x3c   : > { %s424_s11 = scalar_select %p423_p5, %s3348_s19, 1 }
  0x3d   : > { %4263 = sst [smem:[#allocation37_spill]] %s4262_s4  ;;  %p440_p11 = scmp.ne.s32.totalorder %s3312_s27, %s3308_s26 }
  0x3e   : > { %s426_s18 = scalar_select %p425_p9, %s4346_s24, 1 }
  0x3f   : > { %p446_p12 = scmp.ne.s32.totalorder %s3308_s26, %s3304_s25  ;;  %p3595_p2 = por %p440_p11, %p411_p0 }
  0x40   : > { %s427_s9 = ssub.s32 %s424_s11, %s426_s18  ;;  %p2366_p5 = scmp.ge.s32.totalorder %s3356_s21, 1 }
  0x41   : > { %p428_p13 = scmp.eq.s32.totalorder %s427_s9, 0  ;;  %p3601_p3 = por %p446_p12, %p3571_p4 }
  0x42   : > { %s4264_s5 = scalar_select %p3595_p2, 1, 0 }
  0x43   : > { %s4266_s13 = scalar_select %p3601_p3, 1, 0 }
  0x44   : > { %4265 = sst [smem:[#allocation38_spill]] %s4264_s5  ;;  %p454_p9 = scmp.lt.s32.totalorder %s3356_s21, 7 }
  0x45   : > { %4267 = sst [smem:[#allocation39_spill]] %s4266_s13  ;;  %s3358_s18 = smov [#allocation4]  }
  0x46   : > { %s3607_s24 = scalar_select %p428_p13, %s3312_s27, %s430_s17  }
  0x47   : > { %p3610_p7 = pnand %p2366_p5, %p454_p9  ;;  %s467_s9 = sshll.u32 %s3358_s18, 4  ;;  %s468_s9 = int_to_ptr.vmem [resolvable:$true] %s467_s9 }
  0x48   : > { %4268 = sst [smem:[#allocation40_spill]] %s3607_s24  ;;  %p2746_p0 = scmp.lt.s32.totalorder %s3356_s21, 6 }
  0x49   : > { %s4269_s11 = scalar_select %p3610_p7, 1, 0 }
  0x4a   : > { %p2717_p11 = pneg %p3610_p7  ;;  %s533_s1 = sand.u32 1, %s3356_s21  }
  0x4b   : > { %p3620_p4 = pnand %p2746_p0, %p3537_p6  ;;  %p4271_p12 = scmp.eq.s32.totalorder %s3519_s22, 0 }
  0x4c   : > { %s3631_s19 = sand.u32 1, %s3336_s16   ;;  %s2695_s0 = smul.u32 3072, %s4350_s12 }
  0x4d   : > { %s4270_s20 = scalar_select %p3620_p4, 1, 0 }
  0x4e   : > { %p3626_p13 = pnand %p2717_p11, %p4271_p12  ;;  %s2694_s18 = smul.u32 192, %s3631_s19 }
  0x4f   : > { %s4273_s2 = sld [smem:[#allocation43_spill]] }
  0x50   : > { %s4272_s17 = scalar_select %p3626_p13, 1, 0 }
  0x51   : > { %p4210_p5 = pneg %p3626_p13 }
  0x55   : > { %s2994_s23 = scalar_lea.hbm %s4273_s2, 64 }
  0x56   : > { %p2995_p6 = scmp.ne.s32.totalorder %s4273_s2, %s2994_s23  ;;  %p3001_p11 = scmp.lt.u32.totalorder %s2994_s23, %s4273_s2 }
  0x58   : > { %p2997_p9 = pnand %p4210_p5, %p2995_p6 }
  0x5a   : > { %p2998_p0 = pneg %p2997_p9 }
  0x5c   : > { %p3003_p12 = pnand %p3001_p11, %p2998_p0 }
  0x5e   : > { %3006 = shalt.err (!%p3003_p12)
}
  0x5f   : > { %s3007_s4 = scalar_lea.vmem %s468_s9, 64  ;;  %p3015_p1 = scmp.lt.s32.totalorder %s468_s9, %s468_s9 }
  0x60   : > { %p3008_p3 = scmp.ne.s32.totalorder %s468_s9, %s3007_s4  ;;  %p3016_p10 = scmp.lt.s32.totalorder %s3007_s4, %s3007_s4 }
  0x62   : > { %p3010_p8 = pnand %p3008_p3, %p4210_p5  ;;  %p3017_p7 = por %p3016_p10, %p3015_p1 }
  0x64   : > { %p3011_p2 = pneg %p3010_p8 }
  0x66   : > { %p3018_p4 = pnand %p3017_p7, %p3011_p2 }
  0x68   : > { %3021 = shalt.err (!%p3018_p4)
}
  0x69   : > { %2720 = dma.hbm_to_vmem [thread:$0]  (!%p3626_p13), %s4273_s2, 64, %s468_s9, [#allocation5]  }
  0x6a   : > { %s4274_s6 = sld [smem:[#allocation47_spill]]  ;;  %s537_s24 = scalar_lea.vmem [#allocation9], %s2694_s18 }
  0x6b   : > { %s547_s4 = sshll.u32 %s537_s24, 4  ;;  %s3664_s23 = scalar_lea.sflag [#allocation5], %s533_s1  ;;  %s3662_s4 = int_to_ptr.vmem [resolvable:$true] %s547_s4 }
  0x6c   : > { %p4275_p10 = scmp.ne.s32.totalorder %s4270_s20, 0 }
  0x6e   : > { %p3670_p1 = pneg %p4275_p10 }
  0x70   : > { %s3660_s16 = scalar_lea.hbm %s4274_s6, %s2695_s0  ;;  %s3027_s18 = scalar_lea.hbm %s4274_s6, 6144 }
  0x71   : > { %s3022_s28 = scalar_lea.hbm %s3660_s16, 3072  ;;  %p3028_p3 = scmp.lt.u32.totalorder %s3660_s16, %s4274_s6 }
  0x72   : > { %p3023_p7 = scmp.ne.s32.totalorder %s3660_s16, %s3022_s28  ;;  %p3029_p4 = scmp.lt.u32.totalorder %s3027_s18, %s3022_s28 }
  0x73   : > { %s4276_s9 = scalar_select %p3670_p1, 1, 0 }
  0x74   : > { %p3025_p8 = pnand %p3670_p1, %p3023_p7  ;;  %p3030_p6 = por %p3029_p4, %p3028_p3 }
  0x75   : > { %p3031_p9 = scmp.lt.u32.totalorder %s3022_s28, %s3660_s16 }
  0x76   : > { %p3026_p2 = pneg %p3025_p8 }
  0x77   : > { %p3032_p0 = por %p3031_p9, %p3030_p6 }
  0x79   : > { %p3033_p11 = pnand %p3032_p0, %p3026_p2 }
  0x7b   : > { %3036 = shalt.err (!%p3033_p11)
}
  0x7c   : > { %s3037_s1 = scalar_lea.vmem %s3662_s4, 3072  ;;  %s3359_s30 = smov [#allocation9]  }
  0x7d   : > { %p3038_p12 = scmp.ne.s32.totalorder %s3662_s4, %s3037_s1  ;;  %s3042_s24 = sshll.u32 %s3359_s30, 4  ;;  %s3043_s24 = int_to_ptr.vmem [resolvable:$false] %s3042_s24 }
  0x7e   : > { %s3044_s0 = scalar_lea.vmem %s3043_s24, 6144  ;;  %p3045_p5 = scmp.lt.s32.totalorder %s3662_s4, %s3043_s24 }
  0x7f   : > { %p3040_p7 = pnand %p3038_p12, %p3670_p1  ;;  %p3046_p13 = scmp.lt.s32.totalorder %s3044_s0, %s3037_s1 }
  0x81   : > { %p3041_p8 = pneg %p3040_p7  ;;  %p3047_p3 = por %p3046_p13, %p3045_p5 }
  0x83   : > { %p3048_p4 = pnand %p3047_p3, %p3041_p8 }
  0x85   : > { %3051 = shalt.err (!%p3048_p4)
}
  0x86   : > { %s3360_s28 = smov 192   ;;  %s3361_s13 = smov 12  }
  0x87   : > { %2727 = dma.hbm_to_vmem [thread:$0]  (!%p4275_p10), %s3660_s16, 3072, %s3662_s4, %s3664_s23, %s3360_s28, %s3360_s28, %s3361_s13  }
  0x88   : > { %s2372_s18 = sshll.u32 %s3631_s19, 6  ;;  %s2511_s27 = sshll.u32 %s4350_s12, 10 }
  0x89   : > { %s4277_s7 = sld [smem:[#allocation48_spill]]  ;;  %s561_s24 = scalar_lea.vmem [#allocation10], %s2372_s18 }
  0x8a   : > { %s571_s0 = sshll.u32 %s561_s24, 4  ;;  %s2376_s2 = sshll.u32 %s3631_s19, 7  ;;  %s3702_s0 = int_to_ptr.vmem [resolvable:$true] %s571_s0 }
  0x8f   : > { %s3699_s1 = scalar_lea.hbm %s4277_s7, %s2511_s27  ;;  %s3057_s28 = scalar_lea.hbm %s4277_s7, 2048 }
  0x90   : > { %s3052_s6 = scalar_lea.hbm %s3699_s1, 1024  ;;  %p3058_p6 = scmp.lt.u32.totalorder %s3699_s1, %s4277_s7 }
  0x91   : > { %p3053_p13 = scmp.ne.s32.totalorder %s3699_s1, %s3052_s6  ;;  %p3059_p9 = scmp.lt.u32.totalorder %s3057_s28, %s3052_s6 }
  0x92   : > { %p3061_p11 = scmp.lt.u32.totalorder %s3052_s6, %s3699_s1 }
  0x93   : > { %p3055_p5 = pnand %p3053_p13, %p3670_p1  ;;  %p3060_p0 = por %p3059_p9, %p3058_p6 }
  0x95   : > { %p3056_p2 = pneg %p3055_p5  ;;  %p3062_p12 = por %p3061_p11, %p3060_p0 }
  0x97   : > { %p3063_p7 = pnand %p3062_p12, %p3056_p2 }
  0x99   : > { %3066 = shalt.err (!%p3063_p7)
}
  0x9a   : > { %s3067_s18 = scalar_lea.vmem %s3702_s0, 1024  ;;  %s3362_s25 = smov [#allocation10]  }
  0x9b   : > { %p3068_p8 = scmp.ne.s32.totalorder %s3702_s0, %s3067_s18  ;;  %s3072_s30 = sshll.u32 %s3362_s25, 4  ;;  %s3073_s30 = int_to_ptr.vmem [resolvable:$false] %s3072_s30 }
  0x9c   : > { %s3074_s24 = scalar_lea.vmem %s3073_s30, 2048  ;;  %p3075_p13 = scmp.lt.s32.totalorder %s3702_s0, %s3073_s30 }
  0x9d   : > { %p3070_p3 = pnand %p3068_p8, %p3670_p1  ;;  %p3076_p5 = scmp.lt.s32.totalorder %s3074_s24, %s3067_s18 }
  0x9f   : > { %p3071_p4 = pneg %p3070_p3  ;;  %p3077_p6 = por %p3076_p5, %p3075_p13 }
  0xa1   : > { %p3078_p9 = pnand %p3077_p6, %p3071_p4 }
  0xa3   : > { %3081 = shalt.err (!%p3078_p9)
}
  0xa4   : > { %s4213_s6 = smov 64   ;;  %s4215_s16 = smov 4  }
  0xa5   : > { %2730 = dma.hbm_to_vmem [thread:$0]  (!%p4275_p10), %s3699_s1, 1024, %s3702_s0, %s3664_s23, %s4213_s6, %s4213_s6, %s4215_s16  }
  0xa6   : > { %s2512_s4 = sshll.u32 %s4350_s12, 11  ;;  %s585_s28 = scalar_lea.vmem [#allocation11], %s2376_s2 }
  0xa7   : > { %s595_s13 = sshll.u32 %s585_s28, 4  ;;  %s4278_s8 = sld [smem:[#allocation49_spill]]  ;;  %s3739_s13 = int_to_ptr.vmem [resolvable:$true] %s595_s13 }
  0xad   : > { %s3737_s25 = scalar_lea.hbm %s4278_s8, %s2512_s4  ;;  %s3087_s24 = scalar_lea.hbm %s4278_s8, 4096 }
  0xae   : > { %s3082_s30 = scalar_lea.hbm %s3737_s25, 2048  ;;  %p3088_p12 = scmp.lt.u32.totalorder %s3737_s25, %s4278_s8 }
  0xaf   : > { %p3083_p2 = scmp.ne.s32.totalorder %s3737_s25, %s3082_s30  ;;  %p3089_p7 = scmp.lt.u32.totalorder %s3087_s24, %s3082_s30 }
  0xb0   : > { %p3091_p3 = scmp.lt.u32.totalorder %s3082_s30, %s3737_s25 }
  0xb1   : > { %p3085_p0 = pnand %p3083_p2, %p3670_p1  ;;  %p3090_p8 = por %p3089_p7, %p3088_p12 }
  0xb3   : > { %p3086_p11 = pneg %p3085_p0  ;;  %p3092_p4 = por %p3091_p3, %p3090_p8 }
  0xb5   : > { %p3093_p13 = pnand %p3092_p4, %p3086_p11 }
  0xb7   : > { %3096 = shalt.err (!%p3093_p13)
}
  0xb8   : > { %s3097_s27 = scalar_lea.vmem %s3739_s13, 2048  ;;  %s3365_s18 = smov [#allocation11]  }
  0xb9   : > { %p3098_p5 = scmp.ne.s32.totalorder %s3739_s13, %s3097_s27  ;;  %s3102_s1 = sshll.u32 %s3365_s18, 4  ;;  %s3103_s1 = int_to_ptr.vmem [resolvable:$false] %s3102_s1 }
  0xba   : > { %s3104_s6 = scalar_lea.vmem %s3103_s1, 4096  ;;  %p3105_p2 = scmp.lt.s32.totalorder %s3739_s13, %s3103_s1 }
  0xbb   : > { %p3100_p6 = pnand %p3098_p5, %p3670_p1  ;;  %p3106_p0 = scmp.lt.s32.totalorder %s3104_s6, %s3097_s27 }
  0xbd   : > { %p3101_p9 = pneg %p3100_p6  ;;  %p3107_p12 = por %p3106_p0, %p3105_p2 }
  0xbf   : > { %p3108_p7 = pnand %p3107_p12, %p3101_p9 }
  0xc1   : > { %3111 = shalt.err (!%p3108_p7)
}
  0xc2   : > { %s3366_s30 = smov 128   ;;  %s3367_s0 = smov 8  }
  0xc3   : > { %2733 = dma.hbm_to_vmem [thread:$0]  (!%p4275_p10), %s3737_s25, 2048, %s3739_s13, %s3664_s23, %s3366_s30, %s3366_s30, %s3367_s0  }
  0xc4   : > { %s3368_s24 = smov [#allocation7]   ;;  %s3768_s27 = scalar_lea.hbm %s4183_s10, %s2512_s4 }
  0xc5   : > { %s477_s28 = sshll.u32 %s3368_s24, 4  ;;  %s622_s6 = scalar_lea.vmem [#allocation12], %s2376_s2  ;;  %s478_s28 = int_to_ptr.vmem [resolvable:$true] %s477_s28 }
  0xc6   : > { %s632_s16 = sshll.u32 %s622_s6, 4  ;;  %s4279_s3 = sld [smem:[#allocation44_spill]]  ;;  %s3795_s16 = int_to_ptr.vmem [resolvable:$true] %s632_s16 }
  0xc7   : > { %p4280_p8 = scmp.ne.s32.totalorder %s4272_s17, 0 }
  0xc9   : > { %p4281_p3 = pneg %p4280_p8 }
  0xcc   : > { %s3112_s21 = scalar_lea.hbm %s4279_s3, 2048 }
  0xcd   : > { %p3113_p11 = scmp.ne.s32.totalorder %s4279_s3, %s3112_s21  ;;  %p3119_p5 = scmp.lt.u32.totalorder %s3112_s21, %s4279_s3 }
  0xcf   : > { %p3115_p4 = pnand %p3113_p11, %p4281_p3 }
  0xd1   : > { %p3116_p13 = pneg %p3115_p4 }
  0xd3   : > { %p3121_p6 = pnand %p3119_p5, %p3116_p13 }
  0xd5   : > { %3124 = shalt.err (!%p3121_p6)
}
  0xd6   : > { %s3125_s2 = scalar_lea.vmem %s478_s28, 2048  ;;  %p4282_p2 = pmov %p4281_p3 }
  0xd7   : > { %p3126_p9 = scmp.ne.s32.totalorder %s478_s28, %s3125_s2  ;;  %p3133_p7 = scmp.lt.s32.totalorder %s478_s28, %s478_s28 }
  0xd8   : > { %p3134_p10 = scmp.lt.s32.totalorder %s3125_s2, %s3125_s2 }
  0xd9   : > { %p3128_p0 = pnand %p3126_p9, %p4282_p2 }
  0xda   : > { %p3135_p1 = por %p3134_p10, %p3133_p7 }
  0xdb   : > { %p3129_p12 = pneg %p3128_p0 }
  0xdd   : > { %p3136_p3 = pnand %p3135_p1, %p3129_p12 }
  0xdf   : > { %3139 = shalt.err (!%p3136_p3)
}
  0xe0   : > { %s4283_s7 = smov 4   ;;  %s4284_s8 = smov 64  }
  0xe1   : > { %2723 = dma.hbm_to_vmem [thread:$0]  (!%p4280_p8), %s4279_s3, 2048, %s478_s28, [#allocation8], %s4284_s8, %s4284_s8, %s4283_s7  }
  0xe2   : > { %s3140_s14 = scalar_lea.hbm %s3768_s27, 2048  ;;  %p4285_p1 = scmp.ne.s32.totalorder %s4276_s9, 0 }
  0xe3   : > { %p3141_p10 = scmp.ne.s32.totalorder %s3768_s27, %s3140_s14  ;;  %s3145_s4 = scalar_lea.hbm %s4183_s10, 4096 }
  0xe4   : > { %p3146_p13 = scmp.lt.u32.totalorder %s3768_s27, %s4183_s10  ;;  %p3147_p5 = scmp.lt.u32.totalorder %s3145_s4, %s3140_s14 }
  0xe5   : > { %p3143_p11 = pnand %p3141_p10, %p4285_p1  ;;  %p3149_p9 = scmp.lt.u32.totalorder %s3140_s14, %s3768_s27 }
  0xe6   : > { %p3148_p6 = por %p3147_p5, %p3146_p13 }
  0xe7   : > { %p3144_p4 = pneg %p3143_p11 }
  0xe8   : > { %p3150_p2 = por %p3149_p9, %p3148_p6 }
  0xea   : > { %p3151_p8 = pnand %p3150_p2, %p3144_p4 }
  0xec   : > { %3154 = shalt.err (!%p3151_p8)
}
  0xed   : > { %s3155_s0 = scalar_lea.vmem %s3795_s16, 2048  ;;  %s3369_s24 = smov [#allocation12]  }
  0xee   : > { %p3156_p0 = scmp.ne.s32.totalorder %s3795_s16, %s3155_s0  ;;  %s3160_s28 = sshll.u32 %s3369_s24, 4  ;;  %s3161_s28 = int_to_ptr.vmem [resolvable:$false] %s3160_s28 }
  0xef   : > { %s3162_s18 = scalar_lea.vmem %s3161_s28, 4096  ;;  %p3163_p3 = scmp.lt.s32.totalorder %s3795_s16, %s3161_s28 }
  0xf0   : > { %p3158_p12 = pnand %p3156_p0, %p4285_p1  ;;  %p3164_p10 = scmp.lt.s32.totalorder %s3162_s18, %s3155_s0 }
  0xf2   : > { %p3159_p7 = pneg %p3158_p12  ;;  %p3165_p11 = por %p3164_p10, %p3163_p3 }
  0xf4   : > { %p3166_p13 = pnand %p3165_p11, %p3159_p7 }
  0xf6   : > { %3169 = shalt.err (!%p3166_p13)
}
  0xf7   : > { %p4286_p4 = scmp.ne.s32.totalorder %s4270_s20, 0  ;;  %p4287_p1 = scmp.ne.s32.totalorder %s4269_s11, 0 }
  0xf8   : > { %p4288_p5 = scmp.eq.s32.totalorder (!%p4287_p1), %s3519_s22, 0 }
  0xf9   : > { %2736 = dma.hbm_to_vmem [thread:$0]  (!%p4286_p4), %s3768_s27, 2048, %s3795_s16, %s3664_s23, %s4284_s8, %s4284_s8, %s4283_s7  }
  0xfa   : > { %656 = sbr.rel (%p4287_p1) target bundleno = 2682 (0xa7a), region = 68 }
 0x101   : > { %3283 = dma.done.wait (%p4288_p5), [#allocation5], 64   ;;  %p4289_p6 = pmov %p4288_p5 }
 0x102   : > { %p4290_p9 = pmov %p4288_p5 }
 0x103   : > { %3285 = vsyncadd (%p4289_p6), [#allocation5], 4294967232 }
 0x104   : > { %3287 = dma.done.wait (%p4290_p9), [#allocation8], 2048   ;;  %p4291_p2 = pmov %p4288_p5 }
 0x105   : > { %s4292_s20 = sld [smem:[#allocation33_spill]]  ;;  %s666_s9 = sand.u32 1, %s3519_s22  }
 0x106   : > { %3289 = vsyncadd (%p4291_p2), [#allocation8], 4294965248  ;;  %s3834_s23 = sand.u32 1, %s3332_s15   ;;  %s667_s16 = scalar_lea.sflag [#allocation5], %s666_s9 }
 0x107   : > { %s2696_s11 = smul.u32 192, %s3834_s23 }
 0x109   : > { %s3837_s1 = scalar_lea.vmem [#allocation9], %s2696_s11 }
 0x10b   : > { %p4293_p8 = scmp.ne.s32.totalorder %s4292_s20, 0 }
 0x10d   : > { %3291 = dma.done.wait (%p4293_p8), %s667_s16, 8192  }
 0x10e   : > { %3293 = vsyncadd (%p4293_p8), %s667_s16, 4294959104  ;;  %s4294_s27 = sld [smem:[#allocation27_spill]]  ;;  %s4295_s22 = sld [smem:[#allocation26_spill]] }
 0x10f   : > { %s2388_s12 = sshll.u32 %s3834_s23, 7  ;;  %s4227_s13 = sand.u32 1, %s3320_s29  }
 0x110   : > { %s2390_s2 = sshll.u32 %s4227_s13, 4  ;;  %s4226_s7 = sand.u32 1, %s3308_s26  }
 0x111   : > { %s2391_s8 = sshll.u32 %s4226_s7, 4  ;;  %s4296_s0 = sld [smem:[#allocation41_spill]] }
 0x112   : > { %s4297_s20 = sld [smem:[#allocation42_spill]]  ;;  %s4298_s7 = sld [smem:[#allocation46_spill]] }
 0x113   : > { %s4300_s18 = sld [smem:[#allocation50_spill]]  ;;  %s3894_s16 = scalar_lea.vmem [#allocation13], %s2390_s2 }
 0x114   : > { %p794_p0 = scmp.eq.s32.totalorder %s4294_s27, 0  ;;  %s3853_s19 = sshll.u32 %s4295_s22, 4 }
 0x115   : > { %s2398_s17 = sadd.s32 4294967295, %s4294_s27  ;;  %p2412_p11 = scmp.ne.s32.totalorder %s4294_s27, 0 }
 0x116   : > { %s3856_s21 = scalar_select %p794_p0, %s4295_s22, 1 }
 0x117   : > { %s4356_s22 = smov (%p794_p0, %s4295_s22), 0  ;;  %p834_p3 = scmp.gt.s32.totalorder %s2398_s17, 0  ;;  %vm871_vm0 = vcmask (!%p2412_p11), 64512   ;;  %v885_v6 = vld [vmem:[#allocation4] sm:$0xf] (!%p2412_p11)  ;;  %vm889_vm1 = vcmask (!%p2412_p11), 1043456  }
 0x118   : > { %s2392_s14 = sshll.u32 %s3856_s21, 1  ;;  %s2396_s5 = sshll.u32 %s4356_s22, 1  ;;  %v3370_v7 = vmov (!%p2412_p11), 0.0   ;;  %v891_v8 = vsel (!%p2412_p11), %vm889_vm1, %v885_v6, 0  ;;  %vm3371_vm2 = vmmov (!%p2412_p11), 0   ;;  %v2878_v9 = vld [vmem:[#allocation7 + $0x40] sm:$0xff] (!%p2412_p11)  }
 0x119   : > { %p797_p12 = scmp.lt.s32.totalorder %s2392_s14, 3  ;;  %p817_p7 = scmp.lt.s32.totalorder %s2396_s5, 3  ;;  %2592 = vmatprep.subr.bf16.mxu0 (!%p2412_p11), %v3370_v7  ;;  %2594 = vmatprep.mubr.msk.bf16.mxu0 (!%p2412_p11), %vm3371_vm2, %v3370_v7  ;;  %v2880_v10 = vld [vmem:[#allocation7 + $0x48] sm:$0xff] (!%p2412_p11)   ;;  %v2882_v11 = vld [vmem:[#allocation7 + $0x50] sm:$0xff] (!%p2412_p11)   ;;  %v2884_v12 = vld [vmem:[#allocation7 + $0x58] sm:$0xff] (!%p2412_p11)  }
 0x11a   : > { %p2399_p10 = scmp.lt.s32.totalorder %s2398_s17, 1  ;;  %s4362_s17 = smov (!%p834_p3, %s2398_s17), 0  ;;  %2593 = vmatpush3.bf16.msra.mxu0 (!%p2412_p11), %v891_v8  ;;  %2598 = vmatprep.subr.bf16.mxu1 (!%p2412_p11), %v3370_v7  ;;  %v2886_v13 = vld [vmem:[#allocation7 + $0x60] sm:$0xff] (!%p2412_p11)   ;;  %v2888_v14 = vld [vmem:[#allocation7 + $0x68] sm:$0xff] (!%p2412_p11)   ;;  %v2890_v15 = vld [vmem:[#allocation7 + $0x70] sm:$0xff] (!%p2412_p11)  }
 0x11b   : > { %s4358_s14 = smov (!%p797_p12, %s2392_s14), 3  ;;  %s4360_s5 = smov (!%p817_p7, %s2396_s5), 3 }
 0x11c   : > { %s2393_s4 = sshll.u32 %s4358_s14, 3  ;;  %s2397_s11 = sshll.u32 %s4360_s5, 2  ;;  %2618 = vmatprep.subr.bf16.mxu0 (!%p2412_p11), %v3370_v7  ;;  %2614 = vmatprep.mubr.msk.bf16.mxu1 (!%p2412_p11), %vm3371_vm2, %v3370_v7  ;;  %v2892_v16 = vld [vmem:[#allocation7 + $0x78] sm:$0xff] (!%p2412_p11)   ;;  %v2879_v25 = vld [vmem:[#allocation7] sm:$0xff] (!%p2412_p11)   ;;  %v2881_v27 = vld [vmem:[#allocation7 + $0x8] sm:$0xff] (!%p2412_p11)  }
 0x11d   : > { %s800_s24 = scalar_lea.vmem %s4296_s0, %s2393_s4  ;;  %s3867_s9 = scalar_lea.vmem %s4297_s20, %s2393_s4  ;;  %2599 = vmatpush3.bf16.msra.mxu1 (!%p2412_p11), %v2878_v9  ;;  %v2883_v28 = vld [vmem:[#allocation7 + $0x10] sm:$0xff] (!%p2412_p11)   ;;  %v2885_v29 = vld [vmem:[#allocation7 + $0x18] sm:$0xff] (!%p2412_p11)   ;;  %v2887_v30 = vld [vmem:[#allocation7 + $0x20] sm:$0xff] (!%p2412_p11)  }
 0x11e   : > { %s3872_s13 = scalar_lea.vmem %s4298_s7, %s2397_s11  ;;  %s4364_s17 = smov (!%p2399_p10, %s4362_s17), 1  ;;  %v867_v0 = vld [vmem:[%s800_s24] sm:$0xff] (!%p2412_p11)  ;;  %v868_v1 = vld [vmem:[%s800_s24 + $0x8] sm:$0xff] (!%p2412_p11)  ;;  %2600 = vmatprep.subr.bf16.mxu1 (!%p2412_p11), %v3370_v7  ;;  %v2891_v32 = vld [vmem:[#allocation7 + $0x30] sm:$0xff] (!%p2412_p11)  }
 0x11f   : > { %s2404_s14 = sshll.u32 %s4364_s17, 1  ;;  %s4299_s0 = sld [smem:[#allocation51_spill]]  ;;  %v869_v2 = vand.u32 (!%p2412_p11), 2147483647, %v867_v0  ;;  %v870_v3 = vand.u32 (!%p2412_p11), 2147483647, %v868_v1 }
 0x120   : > { %s3884_s5 = scalar_lea.vmem %s4300_s18, %s2404_s14  ;;  %s4301_s20 = sshll.u32 %s3834_s23, 6  ;;  %v2889_v31 = vld [vmem:[#allocation7 + $0x28] sm:$0xff] (!%p2412_p11)   ;;  %v934_v33 = vld [vmem:[%s3867_s9] sm:$0xff] (!%p2412_p11) }
 0x121   : > { %s3888_s3 = scalar_lea.vmem [#allocation10], %s4301_s20  ;;  %s3890_s7 = scalar_lea.vmem [#allocation11], %s2388_s12  ;;  %v872_v4 = vsel (!%p2412_p11), %vm871_vm0, %v869_v2, 0.0  ;;  %v875_v5 = vsel (!%p2412_p11), %vm871_vm0, %v870_v3, 0.0  ;;  %2601 = vmatpush3.bf16.msra.mxu1 (!%p2412_p11), %v2880_v10  ;;  %v935_v34 = vld [vmem:[%s3867_s9 + $0x8] sm:$0xff] (!%p2412_p11)  ;;  %v2893_v36 = vld [vmem:[#allocation7 + $0x38] sm:$0xff] (!%p2412_p11)  }
 0x122   : > { %s3892_s11 = scalar_lea.vmem [#allocation12], %s2388_s12  ;;  %s3896_s22 = scalar_lea.vmem [#allocation14], %s2391_s8  ;;  %873 = vadd.xlane.f32.xlu0 (!%p2412_p11), %v872_v4  ;;  %2602 = vmatprep.subr.bf16.mxu1 (!%p2412_p11), %v3370_v7  ;;  %v953_v35 = vpack.c.bf16 (!%p2412_p11), %v935_v34, %v934_v33 }
 0x123   : > { %866 = sbr.rel (%p2412_p11) target bundleno = 920 (0x398), region = 96  ;;  %s4302_s12 = sld [smem:[#allocation45_spill]] (!%p2412_p11) }
 0x124   : > { %s1178_s2 = scalar_lea.vmem (!%p2412_p11), [#allocation2], %s3853_s19 }
 0x125   : > { %s851_s6 = scalar_lea.vmem %s4299_s0, %s4364_s17  ;;  %2603 = vmatpush3.bf16.msra.mxu1 (!%p2412_p11), %v2882_v11 }
 0x126   : > { %876 = vadd.xlane.f32.xlu0 (!%p2412_p11), %v875_v5  ;;  %2604 = vmatprep.subr.bf16.mxu1 (!%p2412_p11), %v3370_v7 }
 0x129   : > { %2605 = vmatpush3.bf16.msra.mxu1 (!%p2412_p11), %v2884_v12  ;;  %v2430_v47 = vld [vmem:[%s4302_s12] ss:$0 sm:$0xff] (!%p2412_p11) }
 0x12a   : > { %2606 = vmatprep.subr.bf16.mxu1 %v3370_v7 }
 0x12d   : > { %2607 = vmatpush3.bf16.msra.mxu1 %v2886_v13 }
 0x12e   : > { %2608 = vmatprep.subr.bf16.mxu1 %v3370_v7 }
 0x131   : > { %2609 = vmatpush3.bf16.msra.mxu1 %v2888_v14 }
 0x132   : > { %2610 = vmatprep.subr.bf16.mxu1 %v3370_v7 }
 0x135   : > { %2611 = vmatpush3.bf16.msra.mxu1 %v2890_v15 }
 0x136   : > { %2612 = vmatprep.subr.bf16.mxu1 %v3370_v7 }
 0x139   : > { %2613 = vmatpush3.bf16.msra.mxu1 %v2892_v16 }
 0x13c   : > { %2615 = vmatmul.mubr.bf16.vlgmr.msra.gmra.mrb[0].mxu1 %v953_v35 }
 0x1af   : > { %v874_v17 = vpop.xlane.xlu0 %873 }
 0x1b0   : > { %v878_v18 = vmax.f32 %v874_v17, 1e-12 }
 0x1b2   : > { %2894 = vrcp.f32 %v878_v18 }
 0x1b3   : > { %v877_v19 = vpop.xlane.xlu0 %876 }
 0x1b4   : > { %v879_v20 = vmax.f32 %v877_v19, 1e-12 }
 0x1b6   : > { %2896 = vrcp.f32 %v879_v20 }
 0x1bc   : > { %v2895_v21 = vpop.eup %2894 }
 0x1bd   : > { %v881_v23 = vmul.f32 %v2895_v21, %v867_v0 }
 0x1c0   : > { %v2897_v22 = vpop.eup %2896 }
 0x1c1   : > { %v883_v24 = vmul.f32 %v2897_v22, %v868_v1 }
 0x1c3   : > { %v884_v26 = vpack.c.bf16 %v883_v24, %v881_v23 }
 0x1c5   : > { %2595 = vmatmul.mubr.msk.bf16.vlgmr.msra.gmra.mrb[0].mxu0 %vm871_vm0, %v884_v26 }
 0x1c6   : > { %2619 = vmatpush3.bf16.msra.mxu0 %v2879_v25  ;;  %2634 = vmatprep.mubr.msk.bf16.mxu0 %vm3371_vm2, %v3370_v7 }
 0x1c7   : > { %2620 = vmatprep.subr.bf16.mxu0 %v3370_v7 }
 0x1ca   : > { %2621 = vmatpush3.bf16.msra.mxu0 %v2881_v27 }
 0x1cb   : > { %2622 = vmatprep.subr.bf16.mxu0 %v3370_v7 }
 0x1ce   : > { %2623 = vmatpush3.bf16.msra.mxu0 %v2883_v28 }
 0x1cf   : > { %2624 = vmatprep.subr.bf16.mxu0 %v3370_v7 }
 0x1d2   : > { %2625 = vmatpush3.bf16.msra.mxu0 %v2885_v29 }
 0x1d3   : > { %2626 = vmatprep.subr.bf16.mxu0 %v3370_v7 }
 0x1d6   : > { %2627 = vmatpush3.bf16.msra.mxu0 %v2887_v30 }
 0x1d7   : > { %2628 = vmatprep.subr.bf16.mxu0 %v3370_v7 }
 0x1da   : > { %2629 = vmatpush3.bf16.msra.mxu0 %v2889_v31 }
 0x1db   : > { %2630 = vmatprep.subr.bf16.mxu0 %v3370_v7 }
 0x1de   : > { %2631 = vmatpush3.bf16.msra.mxu0 %v2891_v32 }
 0x1df   : > { %2632 = vmatprep.subr.bf16.mxu0 %v3370_v7 }
 0x1e2   : > { %2633 = vmatpush3.bf16.msra.mxu0 %v2893_v36 }
 0x20f   : > { %v1053_v42 = vpop.f32.mrb[0].mxu1 }
 0x210   : > { %v2616_v43 = vpop.f32.mrb[1].mxu1 }
 0x211   : > { %v1056_v44 = vpop.f32.mrb[2].mxu1 }
 0x212   : > { %v2617_v45 = vpop.f32.mrb[3].mxu1 }
 0x298   : > { %v927_v37 = vpop.f32.mrb[0].mxu0 }
 0x299   : > { %v2596_v38 = vpop.f32.mrb[1].mxu0 }
 0x29a   : > { %v930_v39 = vpop.f32.mrb[2].mxu0 }
 0x29b   : > { %v936_v40 = vpack.c.bf16 %v930_v39, %v927_v37  ;;  %v2597_v41 = vpop.f32.mrb[3].mxu0 }
 0x29d   : > { %2635 = vmatmul.mubr.bf16.vlgmr.msra.gmra.mrb[4].mxu0 %v936_v40 }
 0x370   : > { %v1142_v46 = vpop.f32.mrb[4].mxu0 }
 0x371   : > { %v1143_v48 = vadd.f32 %v1142_v46, %v1053_v42  ;;  %v2636_v49 = vpop.f32.mrb[5].mxu0 }
 0x372   : > { %v1145_v50 = vpop.f32.mrb[6].mxu0 }
 0x373   : > { %v1156_v51 = vadd.f32 %v2430_v47, %v1143_v48  ;;  %v1146_v52 = vadd.f32 %v1145_v50, %v1056_v44  ;;  %v2637_v53 = vpop.f32.mrb[7].mxu0 }
 0x375   : > { %v2431_v54 = vmul.f32 -1.442695, %v1156_v51  ;;  %v1157_v55 = vadd.f32 %v2430_v47, %v1146_v52 }
 0x377   : > { %2898 = vpow2.f32 %v2431_v54  ;;  %v2432_v56 = vmul.f32 -1.442695, %v1157_v55 }
 0x379   : > { %2900 = vpow2.f32 %v2432_v56 }
 0x381   : > { %v2899_v57 = vpop.eup %2898 }
 0x382   : > { %v1164_v58 = vadd.f32 1.0, %v2899_v57 }
 0x383   : > { %v2901_v59 = vpop.eup %2900 }
 0x384   : > { %2902 = vrcp.f32 %v1164_v58  ;;  %v1165_v60 = vadd.f32 1.0, %v2901_v59 }
 0x386   : > { %2904 = vrcp.f32 %v1165_v60 }
 0x38e   : > { %v2903_v61 = vpop.eup %2902 }
 0x38f   : > { %v1170_v62 = vmul.f32 %v2903_v61, %v927_v37  ;;  %v1172_v63 = vsub.f32 1.0, %v2903_v61 }
 0x390   : > { %v2905_v0 = vpop.eup %2904 }
 0x391   : > { %v1174_v1 = vmul.f32 %v1172_v63, %v934_v33  ;;  %v1171_v2 = vmul.f32 %v2905_v0, %v930_v39  ;;  %v1173_v3 = vsub.f32 1.0, %v2905_v0 }
 0x393   : > { %v1176_v4 = vadd.f32 %v1174_v1, %v1170_v62  ;;  %v1175_v5 = vmul.f32 %v1173_v3, %v935_v34 }
 0x395   : > { %1179 = vst [vmem:[%s1178_s2] sm:$0xff] %v1176_v4  ;;  %1181 = vst [vmem:[%s3896_s22] sm:$0xff] %v1176_v4  ;;  %v1177_v6 = vadd.f32 %v1175_v5, %v1171_v2 }
 0x397   : > { %1180 = vst [vmem:[%s1178_s2 + $0x8] sm:$0xff] %v1177_v6  ;;  %1182 = vst [vmem:[%s3896_s22 + $0x8] sm:$0xff] %v1177_v6 }
 0x398 PF: > { %s4303_s8 = sld [smem:[#allocation27_spill]] }
 0x39e   : > { %p2433_p13 = scmp.le.s32.totalorder %s4303_s8, 0 }
 0x39f   : > { %s4304_s24 = sld [smem:[#allocation26_spill]] (!%p2433_p13) }
 0x3a0   : > { %1186 = sbr.rel (%p2433_p13) target bundleno = 2625 (0xa41), region = 100 }
 0x3a5   : > { %p2434_p4 = scmp.ne.s32.totalorder (!%p2433_p13), %s4304_s24, 0 }
 0x3a7   : > { %1190 = sbr.rel (%p2434_p4) target bundleno = 1194 (0x4aa), region = 104  ;;  %v2906_v7 = vld [vmem:[%s3837_s1 + $0x4] ss:$12 sps:$4 sm:$0xff] (!%p2434_p4)   ;;  %v2908_v8 = vld [vmem:[%s3837_s1] ss:$12 sps:$4 sm:$0xff] (!%p2434_p4)   ;;  %v3372_v9 = vmov (!%p2434_p4), 0  }
 0x3a8   : > { %1389 = vmatprep.mubr.bf16.mxu0 (!%p2434_p4), %v3372_v9  ;;  %1357 = vmatprep.subr.bf16.mxu0 (!%p2434_p4), %v2906_v7  ;;  %v2909_v10 = vld [vmem:[%s3837_s1 + $0x1c] ss:$12 sps:$4 sm:$0xff] (!%p2434_p4)   ;;  %v2911_v11 = vld [vmem:[%s3837_s1 + $0x18] ss:$12 sps:$4 sm:$0xff] (!%p2434_p4)   ;;  %v2913_v13 = vld [vmem:[%s3837_s1 + $0x34] ss:$12 sps:$4 sm:$0xff] (!%p2434_p4)  }
 0x3a9   : > { %1358 = vmatpush1.bf16.msra.mxu0 (!%p2434_p4), %v2908_v8  ;;  %v2912_v12 = vld [vmem:[%s3837_s1 + $0x8] ss:$12 sps:$4 sm:$0xff] (!%p2434_p4)   ;;  %v2916_v14 = vld [vmem:[%s3837_s1 + $0x20] ss:$12 sps:$4 sm:$0xff] (!%p2434_p4)   ;;  %v2915_v15 = vld [vmem:[%s3837_s1 + $0x30] ss:$12 sps:$4 sm:$0xff] (!%p2434_p4)  }
 0x3aa   : > { %1359 = vmatprep.subr.bf16.mxu0 (!%p2434_p4), %v2909_v10  ;;  %2638 = vmatprep.subr.bf16.mxu1 (!%p2434_p4), %v2912_v12  ;;  %v2917_v16 = vld [vmem:[%s3837_s1 + $0x4c] ss:$12 sps:$4 sm:$0xff] (!%p2434_p4)   ;;  %v2919_v18 = vld [vmem:[%s3837_s1 + $0x48] ss:$12 sps:$4 sm:$0xff] (!%p2434_p4)   ;;  %v2924_v19 = vld [vmem:[%s3837_s1 + $0x50] ss:$12 sps:$4 sm:$0xff] (!%p2434_p4)  }
 0x3ab   : > { %2639 = vmatpush3.bf16.msra.mxu1 (!%p2434_p4), %v2912_v12  ;;  %v2920_v17 = vld [vmem:[%s3837_s1 + $0x38] ss:$12 sps:$4 sm:$0xff] (!%p2434_p4)   ;;  %v2923_v21 = vld [vmem:[%s3837_s1 + $0x60] ss:$12 sps:$4 sm:$0xff] (!%p2434_p4)   ;;  %v2928_v22 = vld [vmem:[%s3837_s1 + $0x68] ss:$12 sps:$4 sm:$0xff] (!%p2434_p4)  }
 0x3ac   : > { %2640 = vmatprep.subr.bf16.mxu1 (!%p2434_p4), %v2916_v14  ;;  %v2921_v20 = vld [vmem:[%s3837_s1 + $0x64] ss:$12 sps:$4 sm:$0xff] (!%p2434_p4)   ;;  %v2925_v23 = vld [vmem:[%s3837_s1 + $0x7c] ss:$12 sps:$4 sm:$0xff] (!%p2434_p4)   ;;  %v1192_v25 = vld [vmem:[#allocation2 + $0x8] sm:$0xff] (!%p2434_p4) }
 0x3ad   : > { %1360 = vmatpush1.bf16.msra.mxu0 (!%p2434_p4), %v2911_v11  ;;  %v1191_v24 = vld [vmem:[#allocation2] sm:$0xff] (!%p2434_p4)  ;;  %v2927_v26 = vld [vmem:[%s3837_s1 + $0x78] ss:$12 sps:$4 sm:$0xff] (!%p2434_p4)   ;;  %v2929_v29 = vld [vmem:[%s3837_s1 + $0x94] ss:$12 sps:$4 sm:$0xff] (!%p2434_p4)  }
 0x3ae   : > { %1361 = vmatprep.subr.bf16.mxu0 %v2913_v13  ;;  %v2932_v27 = vld [vmem:[%s3837_s1 + $0x80] ss:$12 sps:$4 sm:$0xff]   ;;  %v1195_v28 = vpack.c.bf16 %v1192_v25, %v1191_v24  ;;  %v2931_v30 = vld [vmem:[%s3837_s1 + $0x90] ss:$12 sps:$4 sm:$0xff]   ;;  %v2936_v31 = vld [vmem:[%s3837_s1 + $0x98] ss:$12 sps:$4 sm:$0xff]  }
 0x3af   : > { %2641 = vmatpush3.bf16.msra.mxu1 %v2916_v14  ;;  %v2933_v32 = vld [vmem:[%s3837_s1 + $0xac] ss:$12 sps:$4 sm:$0xff]   ;;  %v2935_v33 = vld [vmem:[%s3837_s1 + $0xa8] ss:$12 sps:$4 sm:$0xff]   ;;  %v2937_v34 = vld [vmem:[%s3837_s1 + $0xb0] ss:$12 sps:$4 sm:$0xff]  }
 0x3b0   : > { %2642 = vmatprep.subr.bf16.mxu1 %v2920_v17  ;;  %2654 = vmatprep.mubr.bf16.mxu1 %v1195_v28  ;;  %v1193_v35 = vld [vmem:[#allocation2 + $0x10] sm:$0xff]  ;;  %v1194_v36 = vld [vmem:[#allocation2 + $0x18] sm:$0xff] }
 0x3b1   : > { %1362 = vmatpush1.bf16.msra.mxu0 %v2915_v15  ;;  %v1196_v37 = vpack.c.bf16 %v1194_v36, %v1193_v35 }
 0x3b2   : > { %1363 = vmatprep.subr.bf16.mxu0 %v2917_v16 }
 0x3b3   : > { %2643 = vmatpush3.bf16.msra.mxu1 %v2920_v17 }
 0x3b4   : > { %2644 = vmatprep.subr.bf16.mxu1 %v2924_v19 }
 0x3b5   : > { %1364 = vmatpush1.bf16.msra.mxu0 %v2919_v18 }
 0x3b6   : > { %1365 = vmatprep.subr.bf16.mxu0 %v2921_v20 }
 0x3b7   : > { %2645 = vmatpush3.bf16.msra.mxu1 %v2924_v19 }
 0x3b8   : > { %2646 = vmatprep.subr.bf16.mxu1 %v2928_v22 }
 0x3b9   : > { %1366 = vmatpush1.bf16.msra.mxu0 %v2923_v21 }
 0x3ba   : > { %1367 = vmatprep.subr.bf16.mxu0 %v2925_v23 }
 0x3bb   : > { %2647 = vmatpush3.bf16.msra.mxu1 %v2928_v22 }
 0x3bc   : > { %2648 = vmatprep.subr.bf16.mxu1 %v2932_v27 }
 0x3bd   : > { %1368 = vmatpush1.bf16.msra.mxu0 %v2927_v26 }
 0x3be   : > { %1369 = vmatprep.subr.bf16.mxu0 %v2929_v29 }
 0x3bf   : > { %2649 = vmatpush3.bf16.msra.mxu1 %v2932_v27 }
 0x3c0   : > { %2650 = vmatprep.subr.bf16.mxu1 %v2936_v31 }
 0x3c1   : > { %1370 = vmatpush1.bf16.msra.mxu0 %v2931_v30 }
 0x3c2   : > { %1371 = vmatprep.subr.bf16.mxu0 %v2933_v32 }
 0x3c3   : > { %2651 = vmatpush3.bf16.msra.mxu1 %v2936_v31 }
 0x3c4   : > { %2652 = vmatprep.subr.bf16.mxu1 %v2937_v34 }
 0x3c5   : > { %1372 = vmatpush1.bf16.msra.mxu0 %v2935_v33 }
 0x3c7   : > { %2653 = vmatpush3.bf16.msra.mxu1 %v2937_v34 }
 0x3c8   : > { %1390 = vmatmul.mubr.bf16.vlgmr.msra.gmra.mrb[0].mxu0 %v1195_v28 }
 0x3c9   : > { %1399 = vmatprep.mubr.bf16.mxu0 %v3372_v9 }
 0x3ca   : > { %2655 = vmatmul.mubr.bf16.vlgmr.msra.gmra.mrb[0].mxu1 %v1196_v37 }
 0x3d0   : > { %1400 = vmatmul.mubr.bf16.gmra.mrb[4].mxu0 %v1196_v37 }
 0x49b   : > { %v1391_v38 = vpop.f32.mrb[0].mxu0 }
 0x49c   : > { %v1393_v39 = vpop.f32.mrb[1].mxu0 }
 0x49d   : > { %v1395_v40 = vpop.f32.mrb[2].mxu0  ;;  %v2656_v43 = vpop.f32.mrb[0].mxu1 }
 0x49e   : > { %v1459_v41 = vpack.c.bf16 %v1395_v40, %v1391_v38  ;;  %v1397_v42 = vpop.f32.mrb[3].mxu0  ;;  %v1444_v45 = vpop.f32.mrb[1].mxu1 }
 0x49f   : > { %v1460_v44 = vpack.c.bf16 %v1397_v42, %v1393_v39  ;;  %v2657_v46 = vpop.f32.mrb[2].mxu1 }
 0x4a0   : > { %1465 = vst [vmem:[#allocation3] sm:$0xff] %v1459_v41  ;;  %v1464_v47 = vpack.c.bf16 %v2657_v46, %v2656_v43  ;;  %v1447_v48 = vpop.f32.mrb[3].mxu1 }
 0x4a1   : > { %1466 = vst [vmem:[#allocation3 + $0x8] sm:$0xff] %v1460_v44  ;;  %v1461_v49 = vpack.c.bf16 %v1447_v48, %v1444_v45 }
 0x4a2   : > { %1470 = vst [vmem:[#allocation3 + $0x28] sm:$0xff] %v1464_v47 }
 0x4a3   : > { %v1401_v50 = vpop.f32.mrb[4].mxu0  ;;  %1467 = vst [vmem:[#allocation3 + $0x10] sm:$0xff] %v1461_v49 }
 0x4a4   : > { %v1403_v51 = vpop.f32.mrb[5].mxu0 }
 0x4a5   : > { %v1405_v52 = vpop.f32.mrb[6].mxu0 }
 0x4a6   : > { %v1462_v53 = vpack.c.bf16 %v1405_v52, %v1401_v50  ;;  %v1407_v54 = vpop.f32.mrb[7].mxu0 }
 0x4a7   : > { %v1463_v55 = vpack.c.bf16 %v1407_v54, %v1403_v51 }
 0x4a8   : > { %1468 = vst [vmem:[#allocation3 + $0x18] sm:$0xff] %v1462_v53 }
 0x4a9   : > { %1469 = vst [vmem:[#allocation3 + $0x20] sm:$0xff] %v1463_v55 }
 0x4aa PF: > { %v1480_v56 = vld [vmem:[#allocation3 + $0x8] sm:$0xff]  ;;  %v3373_v57 = vmov 0.0   ;;  %vm3374_vm3 = vmmov 0   ;;  %s1474_s1 = sshra.s32 %s3853_s19, 4  ;;  %v2522_v60 = vld [vmem:[%s3872_s13] sm:$0xff]   ;;  %vm1533_vm4 = vcmask 261120  }
 0x4ab   : > { %2658 = vmatprep.subr.bf16.mxu0 %v3373_v57  ;;  %2662 = vmatprep.mubr.msk.bf16.mxu0 %vm3374_vm3, %v3373_v57  ;;  %s2518_s9 = smul.u32 24, %s1474_s1  ;;  %v2523_v61 = vunpack.c.l.bf16 %v2522_v60  ;;  %v2524_v1 = vunpack.c.h.bf16 %v2522_v60  ;;  %v1482_v19 = vld [vmem:[#allocation3 + $0x10] sm:$0xff]  ;;  %v1483_v20 = vld [vmem:[#allocation3 + $0x28] sm:$0xff]  ;;  %v2939_v22 = vld [vmem:[%s3888_s3 + $0x8] sm:$0xff]   ;;  %s4306_s30 = sld [smem:[#allocation27_spill]] }
 0x4ac   : > { %2659 = vmatpush3.bf16.xpose.msra.mxu0 %v1480_v56  ;;  %2674 = vmatprep.subr.bf16.mxu1 %v3373_v57  ;;  %v2938_v21 = vld [vmem:[%s3888_s3] sm:$0xff]   ;;  %v2940_v23 = vld [vmem:[%s3888_s3 + $0x10] sm:$0xff]   ;;  %v2941_v24 = vld [vmem:[%s3888_s3 + $0x18] sm:$0xff]  }
 0x4ad   : > { %2660 = vmatprep.subr.bf16.mxu0 %v3373_v57  ;;  %2690 = vmatprep.mubr.msk.bf16.mxu1 %vm3374_vm3, %v3373_v57  ;;  %s1478_s14 = scalar_lea.vmem [#allocation3], %s2518_s9  ;;  %v2942_v25 = vld [vmem:[%s3888_s3 + $0x20] sm:$0xff]   ;;  %v2943_v26 = vld [vmem:[%s3888_s3 + $0x28] sm:$0xff]   ;;  %v2944_v27 = vld [vmem:[%s3888_s3 + $0x30] sm:$0xff]  }
 0x4ae   : > { %2675 = vmatpush3.bf16.msra.mxu1 %v2938_v21  ;;  %v2945_v35 = vld [vmem:[%s3888_s3 + $0x38] sm:$0xff]   ;;  %v2946_v36 = vld [vmem:[%s3890_s7] ss:$8 sps:$4 sm:$0xff]   ;;  %v2948_v37 = vld [vmem:[%s3890_s7 + $0x4] ss:$8 sps:$4 sm:$0xff]   ;;  %s4019_s3 = scalar_lea.vmem [#allocation2], %s3853_s19 }
 0x4af   : > { %2676 = vmatprep.subr.bf16.mxu1 %v3373_v57  ;;  %v2951_v38 = vld [vmem:[%s3890_s7 + $0x14] ss:$8 sps:$4 sm:$0xff]   ;;  %v2949_v39 = vld [vmem:[%s3890_s7 + $0x10] ss:$8 sps:$4 sm:$0xff]   ;;  %v2954_v40 = vld [vmem:[%s3890_s7 + $0x24] ss:$8 sps:$4 sm:$0xff]  }
 0x4b0   : > { %v1481_v58 = vld [vmem:[#allocation3 + $0x20] sm:$0xff]  ;;  %v1479_v59 = vld [vmem:[%s1478_s14] sm:$0xff] }
 0x4b1   : > { %v2952_v41 = vld [vmem:[%s3890_s7 + $0x20] ss:$8 sps:$4 sm:$0xff]   ;;  %v2957_v42 = vld [vmem:[%s3890_s7 + $0x34] ss:$8 sps:$4 sm:$0xff]   ;;  %v2955_v43 = vld [vmem:[%s3890_s7 + $0x30] ss:$8 sps:$4 sm:$0xff]  }
 0x4b2   : > { %2677 = vmatpush3.bf16.msra.mxu1 %v2939_v22  ;;  %v2960_v44 = vld [vmem:[%s3890_s7 + $0x44] ss:$8 sps:$4 sm:$0xff]   ;;  %v2958_v45 = vld [vmem:[%s3890_s7 + $0x40] ss:$8 sps:$4 sm:$0xff]   ;;  %v2963_v46 = vld [vmem:[%s3890_s7 + $0x54] ss:$8 sps:$4 sm:$0xff]  }
 0x4b3   : > { %2678 = vmatprep.subr.bf16.mxu1 %v3373_v57  ;;  %v2961_v47 = vld [vmem:[%s3890_s7 + $0x50] ss:$8 sps:$4 sm:$0xff]   ;;  %v2966_v48 = vld [vmem:[%s3890_s7 + $0x64] ss:$8 sps:$4 sm:$0xff]   ;;  %v2964_v49 = vld [vmem:[%s3890_s7 + $0x60] ss:$8 sps:$4 sm:$0xff]  }
 0x4b4   : > { %2661 = vmatpush3.bf16.xpose.msra.mxu0 %v1481_v58  ;;  %v2969_v55 = vld [vmem:[%s3890_s7 + $0x74] ss:$8 sps:$4 sm:$0xff]   ;;  %v2967_v56 = vld [vmem:[%s3890_s7 + $0x70] ss:$8 sps:$4 sm:$0xff]   ;;  %v2970_v58 = vld [vmem:[%s3892_s11 + $0x40] sm:$0xff]   ;;  %p2502_p1 = scmp.ne.s32.totalorder %s4306_s30, 2 }
 0x4b5   : > { %2666 = vmatprep.subr.bf16.mxu0 %v3373_v57  ;;  %v2972_v60 = vld [vmem:[%s3892_s11 + $0x48] sm:$0xff]   ;;  %v1726_v22 = vld [vmem:[%s3884_s5] sm:$0x3] }
 0x4b6   : > { %2679 = vmatpush3.bf16.msra.mxu1 %v2940_v23 }
 0x4b7   : > { %2680 = vmatprep.subr.bf16.mxu1 %v3373_v57 }
 0x4ba   : > { %2681 = vmatpush3.bf16.msra.mxu1 %v2941_v24 }
 0x4bb   : > { %2663 = vmatmul.mubr.bf16.vlgmr.msra.gmra.mrb[0].mxu0 %v1479_v59  ;;  %2682 = vmatprep.subr.bf16.mxu1 %v3373_v57  ;;  %v2971_v59 = vld [vmem:[%s3892_s11] sm:$0xff]  }
 0x4bc   : > { %2670 = vmatprep.mubr.msk.bf16.mxu0 %vm3374_vm3, %v3373_v57  ;;  %2667 = vmatpush3.bf16.msra.mxu0 %v1482_v19  ;;  %v1728_v19 = vlaneseq }
 0x4bd   : > { %2668 = vmatprep.subr.bf16.mxu0 %v3373_v57 }
 0x4be   : > { %2683 = vmatpush3.bf16.msra.mxu1 %v2942_v25 }
 0x4bf   : > { %2684 = vmatprep.subr.bf16.mxu1 %v3373_v57 }
 0x4c0   : > { %2669 = vmatpush3.bf16.msra.mxu0 %v1483_v20  ;;  %v1729_v20 = vshrl.u32 %v1728_v19, 7 }
 0x4c1   : > { %1818 = vmatprep.subr.bf16.mxu0 %v2948_v37 }
 0x4c2   : > { %2685 = vmatpush3.bf16.msra.mxu1 %v2943_v26  ;;  %v1730_v21 = vsub.s32 0, %v1729_v20  ;;  %v1734_v23 = vsub.s32 1, %v1729_v20 }
 0x4c3   : > { %2686 = vmatprep.subr.bf16.mxu1 %v3373_v57 }
 0x4c4   : > { %v1731_v24 = vrot.slane %v1726_v22, %v1730_v21  ;;  %v1735_v25 = vrot.slane %v1726_v22, %v1734_v23 }
 0x4c6   : > { %2687 = vmatpush3.bf16.msra.mxu1 %v2944_v27 }
 0x4c7   : > { %2688 = vmatprep.subr.bf16.mxu1 %v3373_v57  ;;  %v3375_v57 = vmov 0  }
 0x4ca   : > { %2689 = vmatpush3.bf16.msra.mxu1 %v2945_v35 }
 0x4cb   : > { %2570 = vmatprep.subr.bf16.mxu1 %v2970_v58 }
 0x58e   : > { %v1518_v62 = vpop.f32.mrb[0].mxu0 }
 0x58f   : > { %v1525_v63 = vmul.f32 0.088388346, %v1518_v62  ;;  %v2664_v0 = vpop.f32.mrb[1].mxu0  ;;  %v2974_v62 = vld [vmem:[%s3892_s11 + $0x50] sm:$0xff]  }
 0x590   : > { %v1521_v2 = vpop.f32.mrb[2].mxu0  ;;  %v2976_v0 = vld [vmem:[%s3892_s11 + $0x58] sm:$0xff]  }
 0x591   : > { %v1526_v3 = vmul.f32 0.088388346, %v1521_v2  ;;  %v2665_v4 = vpop.f32.mrb[3].mxu0  ;;  %v1531_v5 = vadd.f32 %v2523_v61, %v1525_v63  ;;  %v2973_v61 = vld [vmem:[%s3892_s11 + $0x8] sm:$0xff]   ;;  %v2975_v63 = vld [vmem:[%s3892_s11 + $0x10] sm:$0xff]   ;;  %v2978_v2 = vld [vmem:[%s3892_s11 + $0x60] sm:$0xff]  }
 0x592   : > { %v2980_v4 = vld [vmem:[%s3892_s11 + $0x68] sm:$0xff]  }
 0x593   : > { %v1534_v6 = vsel %vm1533_vm4, %v1531_v5, -inf  ;;  %v1532_v7 = vadd.f32 %v2524_v1, %v1526_v3  ;;  %v2977_v1 = vld [vmem:[%s3892_s11 + $0x18] sm:$0xff]   ;;  %v2979_v3 = vld [vmem:[%s3892_s11 + $0x20] sm:$0xff]  }
 0x594   : > { %1535 = vmax.xlane.f32.xlu0 %v1534_v6 }
 0x595   : > { %v1537_v8 = vsel %vm1533_vm4, %v1532_v7, -inf }
 0x598   : > { %1538 = vmax.xlane.f32.xlu0 %v1537_v8 }
 0x621   : > { %v1536_v9 = vpop.xlane.xlu0 %1535 }
 0x622   : > { %v1540_v10 = vsub.f32 %v1531_v5, %v1536_v9  ;;  %v1472_v5 = vld [vmem:[%s4019_s3] sm:$0xff] }
 0x624   : > { %v1542_v11 = vmul.f32 1.442695, %v1540_v10 }
 0x625   : > { %v1539_v12 = vpop.xlane.xlu0 %1538 }
 0x626   : > { %2986 = vpow2.f32 %v1542_v11  ;;  %v1541_v13 = vsub.f32 %v1532_v7, %v1539_v12  ;;  %v1473_v7 = vld [vmem:[%s4019_s3 + $0x8] sm:$0xff] }
 0x628   : > { %v1544_v14 = vmul.f32 1.442695, %v1541_v13 }
 0x62a   : > { %2988 = vpow2.f32 %v1544_v14  ;;  %v2981_v14 = vld [vmem:[%s3892_s11 + $0x28] sm:$0xff]  }
 0x630   : > { %v2987_v15 = vpop.eup %2986 }
 0x631   : > { %v1546_v16 = vsel %vm1533_vm4, %v2987_v15, 0.0 }
 0x632   : > { %1547 = vadd.xlane.f32.xlu1 %v1546_v16  ;;  %v2983_v16 = vld [vmem:[%s3892_s11 + $0x30] sm:$0xff]  }
 0x634   : > { %v2989_v17 = vpop.eup %2988 }
 0x635   : > { %v1549_v18 = vsel %vm1533_vm4, %v2989_v17, 0.0 }
 0x636   : > { %1550 = vadd.xlane.f32.xlu1 %v1549_v18  ;;  %v2985_v18 = vld [vmem:[%s3892_s11 + $0x38] sm:$0xff]  }
 0x6bf   : > { %v1548_v28 = vpop.xlane.xlu1 %1547 }
 0x6c0   : > { %2990 = vrcp.f32 %v1548_v28 }
 0x6c3   : > { %v1551_v29 = vpop.xlane.xlu1 %1550 }
 0x6c4   : > { %2992 = vrcp.f32 %v1551_v29 }
 0x6ca   : > { %v2991_v30 = vpop.eup %2990 }
 0x6cb   : > { %v1554_v32 = vmul.f32 %v2991_v30, %v2987_v15  ;;  %v2982_v15 = vld [vmem:[%s3892_s11 + $0x70] sm:$0xff]  }
 0x6ce   : > { %v2993_v31 = vpop.eup %2992 }
 0x6cf   : > { %v1555_v33 = vmul.f32 %v2993_v31, %v2989_v17  ;;  %v2984_v17 = vld [vmem:[%s3892_s11 + $0x78] sm:$0xff]  }
 0x6d1   : > { %v1556_v34 = vpack.c.bf16 %v1555_v33, %v1554_v32 }
 0x6d3   : > { %2671 = vmatmul.mubr.msk.bf16.vlgmr.msra.gmra.mrb[4].mxu0 %vm1533_vm4, %v1556_v34 }
 0x6d4   : > { %1819 = vmatpush1.bf16.msra.mxu0 %v2946_v36  ;;  %1850 = vmatprep.mubr.bf16.mxu0 %v3375_v57 }
 0x6d5   : > { %1820 = vmatprep.subr.bf16.mxu0 %v2951_v38 }
 0x6d8   : > { %1821 = vmatpush1.bf16.msra.mxu0 %v2949_v39 }
 0x6d9   : > { %1822 = vmatprep.subr.bf16.mxu0 %v2954_v40 }
 0x6dc   : > { %1823 = vmatpush1.bf16.msra.mxu0 %v2952_v41 }
 0x6dd   : > { %1824 = vmatprep.subr.bf16.mxu0 %v2957_v42 }
 0x6e0   : > { %1825 = vmatpush1.bf16.msra.mxu0 %v2955_v43 }
 0x6e1   : > { %1826 = vmatprep.subr.bf16.mxu0 %v2960_v44  ;;  %v2501_v44 = vld [vmem:[%s851_s6] ss:$0 sm:$0xff] }
 0x6e4   : > { %1827 = vmatpush1.bf16.msra.mxu0 %v2958_v45 }
 0x6e5   : > { %1828 = vmatprep.subr.bf16.mxu0 %v2963_v46 }
 0x6e8   : > { %1829 = vmatpush1.bf16.msra.mxu0 %v2961_v47 }
 0x6e9   : > { %1830 = vmatprep.subr.bf16.mxu0 %v2966_v48 }
 0x6ec   : > { %1831 = vmatpush1.bf16.msra.mxu0 %v2964_v49 }
 0x6ed   : > { %1832 = vmatprep.subr.bf16.mxu0 %v2969_v55 }
 0x6f0   : > { %1833 = vmatpush1.bf16.msra.mxu0 %v2967_v56 }
 0x7a6   : > { %v1594_v50 = vpop.f32.mrb[4].mxu0 }
 0x7a7   : > { %v2672_v51 = vpop.f32.mrb[5].mxu0 }
 0x7a8   : > { %v1597_v52 = vpop.f32.mrb[6].mxu0 }
 0x7a9   : > { %v1601_v53 = vpack.c.bf16 %v1597_v52, %v1594_v50  ;;  %v2673_v54 = vpop.f32.mrb[7].mxu0 }
 0x7ab   : > { %2691 = vmatmul.mubr.bf16.vlgmr.msra.gmra.mrb[0].mxu1 %v1601_v53 }
 0x7ac   : > { %2571 = vmatpush3.bf16.msra.mxu1 %v2971_v59 }
 0x7ad   : > { %2572 = vmatprep.subr.bf16.mxu1 %v2972_v60 }
 0x7b0   : > { %2573 = vmatpush3.bf16.msra.mxu1 %v2973_v61 }
 0x7b1   : > { %2574 = vmatprep.subr.bf16.mxu1 %v2974_v62 }
 0x7b4   : > { %2575 = vmatpush3.bf16.msra.mxu1 %v2975_v63 }
 0x7b5   : > { %2576 = vmatprep.subr.bf16.mxu1 %v2976_v0 }
 0x7b8   : > { %2577 = vmatpush3.bf16.msra.mxu1 %v2977_v1 }
 0x7b9   : > { %2578 = vmatprep.subr.bf16.mxu1 %v2978_v2 }
 0x7bc   : > { %2579 = vmatpush3.bf16.msra.mxu1 %v2979_v3 }
 0x7bd   : > { %2580 = vmatprep.subr.bf16.mxu1 %v2980_v4 }
 0x7c0   : > { %2581 = vmatpush3.bf16.msra.mxu1 %v2981_v14 }
 0x7c1   : > { %2582 = vmatprep.subr.bf16.mxu1 %v2982_v15 }
 0x7c4   : > { %2583 = vmatpush3.bf16.msra.mxu1 %v2983_v16 }
 0x7c5   : > { %2584 = vmatprep.subr.bf16.mxu1 %v2984_v17 }
 0x7c8   : > { %2585 = vmatpush3.bf16.msra.mxu1 %v2985_v18 }
 0x87e   : > { %v1700_v6 = vpop.f32.mrb[0].mxu1 }
 0x87f   : > { %v2692_v8 = vpop.f32.mrb[1].mxu1  ;;  %v1707_v10 = vadd.f32 %v1700_v6, %v1472_v5 }
 0x880   : > { %v1703_v9 = vpop.f32.mrb[2].mxu1 }
 0x881   : > { %v1708_v11 = vadd.f32 %v1703_v9, %v1473_v7  ;;  %v2693_v12 = vpop.f32.mrb[3].mxu1 }
 0x883   : > { %v1709_v13 = vpack.c.bf16 %v1708_v11, %v1707_v10 }
 0x885   : > { %1851 = vmatmul.mubr.bf16.vlgmr.msra.gmra.mrb[8].mxu0 %v1709_v13 }
 0x958   : > { %v1852_v26 = vpop.f32.mrb[8].mxu0 }
 0x959   : > { %v1853_v27 = vadd.f32 %v1852_v26, %v1731_v24  ;;  %v1854_v28 = vpop.f32.mrb[9].mxu0 }
 0x95a   : > { %v1855_v29 = vadd.f32 %v1854_v28, %v1735_v25  ;;  %v1856_v30 = vpop.f32.mrb[10].mxu0 }
 0x95b   : > { %v1857_v31 = vadd.f32 %v1856_v30, %v1731_v24  ;;  %v1858_v32 = vpop.f32.mrb[11].mxu0  ;;  %v1861_v34 = vmax.f32 %v1853_v27, 0.0 }
 0x95c   : > { %v1859_v33 = vadd.f32 %v1858_v32, %v1735_v25  ;;  %v1862_v36 = vmax.f32 %v1855_v29, 0.0 }
 0x95d   : > { %v1863_v35 = vmax.f32 %v1857_v31, 0.0 }
 0x95e   : > { %v1864_v37 = vmax.f32 %v1859_v33, 0.0 }
 0x95f   : > { %v1865_v38 = vpack.c.bf16 %v1863_v35, %v1861_v34 }
 0x960   : > { %v1866_v39 = vpack.c.bf16 %v1864_v37, %v1862_v36 }
 0x962   : > { %2027 = vmatprep.mubr.bf16.mxu1 %v1866_v39 }
 0x963   : > { %2028 = vmatmul.mubr.bf16.vlgmr.msra.gmra.mrb[4].mxu1 %v1865_v38 }
 0xa36   : > { %v2586_v40 = vpop.f32.mrb[4].mxu1 }
 0xa37   : > { %v2587_v41 = vpop.f32.mrb[5].mxu1 }
 0xa38   : > { %v2588_v42 = vadd.f32 %v2587_v41, %v2586_v40  ;;  %v2589_v43 = vpop.f32.mrb[6].mxu1 }
 0xa39   : > { %v2590_v45 = vpop.f32.mrb[7].mxu1 }
 0xa3a   : > { %v2036_v46 = vadd.f32 %v2588_v42, %v1707_v10  ;;  %v2591_v47 = vadd.f32 %v2590_v45, %v2589_v43  ;;  %2052 = sbr.rel (%p2502_p1) target bundleno = 2625 (0xa41), region = 108 }
 0xa3c   : > { %v2045_v48 = vadd.f32 %v2501_v44, %v2036_v46  ;;  %v2037_v49 = vadd.f32 %v2591_v47, %v1708_v11 }
 0xa3e   : > { %2047 = vst [vmem:[%s4019_s3] sm:$0xff] %v2045_v48  ;;  %v2046_v50 = vadd.f32 %v2501_v44, %v2037_v49  ;;  %2053 = vst [vmem:[%s3894_s16] sm:$0xff] (!%p2502_p1), %v2045_v48 }
 0xa40   : > { %2048 = vst [vmem:[%s4019_s3 + $0x8] sm:$0xff] %v2046_v50  ;;  %2054 = vst [vmem:[%s3894_s16 + $0x8] sm:$0xff] (!%p2502_p1), %v2046_v50 }
 0xa41 PF: > { %s4307_s0 = sld [smem:[#allocation27_spill]]  ;;  %s4308_s6 = sld [smem:[#allocation26_spill]] }
 0xa42   : > { %s4309_s17 = sld [smem:[#allocation35_spill]]  ;;  %s2076_s28 = sshll.u32 %s3894_s16, 4  ;;  %s4042_s28 = int_to_ptr.vmem [resolvable:$true] %s2076_s28 }
 0xa43   : > { %s4310_s20 = sld [smem:[#allocation52_spill]]  ;;  %s2520_s23 = sshll.u32 %s3856_s21, 8 }
 0xa44   : > { %s4312_s27 = sand.u32 1, %s3320_s29   ;;  %s3170_s2 = scalar_lea.vmem %s4042_s28, 256 }
 0xa45   : > { %s4052_s12 = scalar_lea.sflag [#allocation6], %s4312_s27  ;;  %p3171_p6 = scmp.ne.s32.totalorder %s4042_s28, %s3170_s2 }
 0xa46   : > { %s3376_s16 = smov [#allocation13]  }
 0xa47   : > { %p2068_p5 = scmp.eq.s32.totalorder %s4307_s0, 2  ;;  %s3174_s8 = sshll.u32 %s3376_s16, 4  ;;  %s3175_s8 = int_to_ptr.vmem [resolvable:$false] %s3174_s8 }
 0xa48   : > { %p4313_p9 = scmp.ne.s32.totalorder %s4309_s17, 0  ;;  %s3176_s24 = scalar_lea.vmem %s3175_s8, 512 }
 0xa49   : > { %s4366_s6 = smov (!%p2068_p5, %s4308_s6), 0  ;;  %s4311_s7 = smov %s4310_s20 }
 0xa4a   : > { %s2519_s4 = sshll.u32 %s4366_s6, 8  ;;  %p3172_p2 = pnand %p3171_p6, %p4313_p9 }
 0xa4b   : > { %s4047_s11 = scalar_lea.hbm %s4310_s20, %s2519_s4  ;;  %p3177_p0 = scmp.lt.s32.totalorder %s4042_s28, %s3175_s8 }
 0xa4c   : > { %p3173_p8 = pneg %p3172_p2  ;;  %p3178_p12 = scmp.lt.s32.totalorder %s3176_s24, %s3170_s2 }
 0xa4e   : > { %p3179_p7 = por %p3178_p12, %p3177_p0 }
 0xa50   : > { %p3180_p3 = pnand %p3179_p7, %p3173_p8 }
 0xa52   : > { %3183 = shalt.err (!%p3180_p3)
}
 0xa53   : > { %s3184_s1 = scalar_lea.hbm %s4047_s11, 256  ;;  %s3188_s3 = scalar_lea.hbm %s4311_s7, 512 }
 0xa54   : > { %p3185_p10 = scmp.ne.s32.totalorder %s4047_s11, %s3184_s1  ;;  %p3189_p4 = scmp.lt.u32.totalorder %s4047_s11, %s4311_s7 }
 0xa55   : > { %p3190_p1 = scmp.lt.u32.totalorder %s3188_s3, %s3184_s1  ;;  %p3192_p6 = scmp.lt.u32.totalorder %s3184_s1, %s4047_s11 }
 0xa56   : > { %p3186_p11 = pnand %p3185_p10, %p4313_p9 }
 0xa57   : > { %p3191_p5 = por %p3190_p1, %p3189_p4 }
 0xa58   : > { %p3187_p13 = pneg %p3186_p11 }
 0xa59   : > { %p3193_p2 = por %p3192_p6, %p3191_p5 }
 0xa5b   : > { %p3194_p8 = pnand %p3193_p2, %p3187_p13 }
 0xa5d   : > { %3197 = shalt.err (!%p3194_p8)
}
 0xa5e   : > { %s3377_s25 = smov 128   ;;  %s4314_s30 = sld [smem:[#allocation38_spill]] }
 0xa5f   : > { %s3378_s0 = smov 8   ;;  %s4315_s18 = sld [smem:[#allocation53_spill]] }
 0xa60   : > { %2713 = dma.vmem_to_hbm [thread:$0]  (%p4313_p9), %s4042_s28, 256, %s4047_s11, %s4052_s12, %s3377_s25, %s3377_s25, %s3378_s0  }
 0xa61   : > { %s2094_s27 = sshll.u32 %s3896_s22, 4  ;;  %s4317_s2 = sand.u32 1, %s3308_s26   ;;  %s4087_s27 = int_to_ptr.vmem [resolvable:$true] %s2094_s27 }
 0xa62   : > { %s4091_s16 = scalar_lea.sflag [#allocation15], %s4317_s2  ;;  %s3198_s17 = scalar_lea.vmem %s4087_s27, 256 }
 0xa63   : > { %p3199_p0 = scmp.ne.s32.totalorder %s4087_s27, %s3198_s17  ;;  %s3379_s21 = smov [#allocation14]  }
 0xa64   : > { %p4318_p12 = scmp.ne.s32.totalorder %s4314_s30, 0  ;;  %s3202_s28 = sshll.u32 %s3379_s21, 4  ;;  %s3203_s28 = int_to_ptr.vmem [resolvable:$false] %s3202_s28 }
 0xa65   : > { %s4316_s5 = smov %s4315_s18  ;;  %s4084_s20 = scalar_lea.hbm %s4315_s18, %s2520_s23 }
 0xa66   : > { %p3200_p7 = pnand %p3199_p0, %p4318_p12  ;;  %s3204_s11 = scalar_lea.vmem %s3203_s28, 512 }
 0xa67   : > { %p3205_p3 = scmp.lt.s32.totalorder %s4087_s27, %s3203_s28  ;;  %p3206_p10 = scmp.lt.s32.totalorder %s3204_s11, %s3198_s17 }
 0xa68   : > { %p3201_p9 = pneg %p3200_p7 }
 0xa69   : > { %p3207_p11 = por %p3206_p10, %p3205_p3 }
 0xa6b   : > { %p3208_p13 = pnand %p3207_p11, %p3201_p9 }
 0xa6d   : > { %3211 = shalt.err (!%p3208_p13)
}
 0xa6e   : > { %s3212_s22 = scalar_lea.hbm %s4084_s20, 256  ;;  %s3216_s8 = scalar_lea.hbm %s4316_s5, 512 }
 0xa6f   : > { %p3213_p4 = scmp.ne.s32.totalorder %s4084_s20, %s3212_s22  ;;  %p3217_p6 = scmp.lt.u32.totalorder %s4084_s20, %s4316_s5 }
 0xa70   : > { %p3218_p2 = scmp.lt.u32.totalorder %s3216_s8, %s3212_s22  ;;  %p3220_p0 = scmp.lt.u32.totalorder %s3212_s22, %s4084_s20 }
 0xa71   : > { %p3214_p1 = pnand %p3213_p4, %p4318_p12 }
 0xa72   : > { %p3219_p8 = por %p3218_p2, %p3217_p6 }
 0xa73   : > { %p3215_p5 = pneg %p3214_p1 }
 0xa74   : > { %p3221_p7 = por %p3220_p0, %p3219_p8 }
 0xa76   : > { %p3222_p9 = pnand %p3221_p7, %p3215_p5 }
 0xa78   : > { %3225 = shalt.err (!%p3222_p9)
}
 0xa79   : > { %2714 = dma.vmem_to_hbm [thread:$0]  (%p4318_p12), %s4087_s27, 256, %s4084_s20, %s4091_s16, %s3377_s25, %s3377_s25, %s3378_s0  }
 0xa7a PF: > { %s4319_s9 = sld [smem:[#allocation30_spill]]  ;;  %s4320_s14 = sld [smem:[#allocation23_spill]] }
 0xa7b   : > { %s4321_s3 = sld [smem:[#allocation37_spill]] }
 0xa80   : > { %p2749_p3 = scmp.ge.s32.totalorder %s4319_s9, 2  ;;  %s2109_s13 = sand.u32 1, %s4320_s14  }
 0xa81   : > { %p4322_p10 = scmp.ne.s32.totalorder %s4321_s3, 0  ;;  %s2110_s19 = scalar_lea.sflag [#allocation6], %s2109_s13 }
 0xa83   : > { %p2738_p11 = pnand %p2749_p3, %p4322_p10 }
 0xa85   : > { %3295 = dma.done.wait (!%p2738_p11), %s2110_s19, 256  }
 0xa86   : > { %3297 = vsyncadd (!%p2738_p11), %s2110_s19, 4294967040  ;;  %s4323_s6 = sld [smem:[#allocation21_spill]]  ;;  %s4324_s30 = sld [smem:[#allocation39_spill]] }
 0xa8c   : > { %s2118_s4 = sand.u32 1, %s4323_s6   ;;  %p4325_p13 = scmp.ne.s32.totalorder %s4324_s30, 0 }
 0xa8d   : > { %s2119_s18 = scalar_lea.sflag [#allocation15], %s2118_s4 }
 0xa8e   : > { %p2741_p4 = pnand %p2749_p3, %p4325_p13 }
 0xa90   : > { %3299 = dma.done.wait (!%p2741_p4), %s2119_s18, 256  }
 0xa91   : > { %3301 = vsyncadd (!%p2741_p4), %s2119_s18, 4294967040  ;;  %s32_s21 = sadd.s32 1, %s4319_s9   ;;  %s4327_s0 = sld [smem:[#allocation22_spill]] }
 0xa92   : > { %p4126_p12 = scmp.ge.s32.totalorder %s32_s21, 8   ;;  %s4328_s27 = sld [smem:[#allocation40_spill]] }
 0xa93   : > { %s4329_s20 = sld [smem:[#allocation24_spill]]  ;;  %s4330_s30 = sld [smem:[#allocation36_spill]] }
 0xa94   : > { %s4331_s2 = sld [smem:[#allocation25_spill]]  ;;  %s4332_s16 = sld [smem:[#allocation34_spill]] }
 0xa95   : > { %s4333_s17 = sld [smem:[#allocation28_spill]]  ;;  %s4334_s18 = sld [smem:[#allocation29_spill]] }
 0xa96   : > { %s4335_s19 = sld [smem:[#allocation31_spill]]  ;;  %s4336_s11 = sld [smem:[#allocation32_spill]] }
 0xa97   : > { %s4338_s25 = smov %s3308_s26  ;;  %s4339_s26 = smov %s4327_s0 }
 0xa98   : > { %s4340_s28 = smov %s3320_s29  ;;  %s4342_s14 = smov %s3332_s15 }
 0xa99   : > { %s4341_s29 = smov %s4329_s20  ;;  %31 = sbr.rel (!%p4126_p12) target bundleno = 26 (0x1a), region = 205 }
 0xa9a   : > { %s4343_s15 = smov %s4331_s2 }
 0xa9c   : > { %s4344_s20 = smov %s4336_s11 }
 0xaa0   :  { %2124 = vsyncpa [#allocation5], 1 }
 0xaa1   :  { %2126 = vsyncpa [#allocation5 + $0x1], 1 }
 0xaa2   :  { %2127 = vsyncpa [#allocation8], 1 }
 0xaa3   :  { %2128 = vsyncpa [#allocation6], 1 }
 0xaa4   :  { %2130 = vsyncpa [#allocation6 + $0x1], 1 }
 0xaa5   :  { %2131 = vsyncpa [#allocation15], 1 }
 0xaa6   :  { %2133 = vsyncpa [#allocation15 + $0x1], 1 }

</bundles_post_ra>
